<compile_context>
chip_gen: v5e
topology: v5e:2x2
jax: 0.10.0
libtpu: 0.0.40
codegen_flags: <defaults>
</compile_context>

<pallas_src>
import jax
import jax.numpy as jnp
from jax import lax
from jax.experimental import pallas as pl
from jax.experimental.pallas import tpu as pltpu

TIMESTAMP = 6
DECAY = 0.2          # self.k in the reference module
C_IN = 3
C_FEAT = 192
N_CLASSES = 10
LANE = 128           # class dim padded to a full lane width for dense stores


# ----------------------------------------------------------------------------
# Wrapper: single fused pallas_call (conv stem + pool + SNN time loop + linear)
# ----------------------------------------------------------------------------
def auto_stereo_forward(x, conv_w, conv_b, cls_w, cls_b, timestamp=TIMESTAMP):
    """x: (N, C_IN, H, W) float32 (NCHW, as in PyTorch)."""
    N, C, H, W = x.shape
    assert C == C_IN
    Hp, Wp = H + 2, W + 2
    inv_hw = 1.0 / float(H * W)
    inv_t = 1.0 / float(timestamp)

    # ---- tiny glue (no 9x im2col duplication, no feature map in HBM) ----
    xp = jnp.pad(x, ((0, 0), (0, 0), (1, 1), (1, 1)))            # (N, C, Hp, Wp)
    w9 = conv_w.transpose(2, 3, 1, 0).reshape(9, C_IN, C_FEAT)   # (tap, cin, cout)
    bconv = conv_b.reshape(1, C_FEAT)
    wcls = jnp.pad(cls_w.T, ((0, 0), (0, LANE - N_CLASSES)))     # (192, 128)
    bcls = jnp.pad(cls_b.reshape(1, N_CLASSES),
                   ((0, 0), (0, LANE - N_CLASSES)))              # (1, 128)

    def kernel(xp_ref, w9_ref, bconv_ref, wcls_ref, bcls_ref,
               lpt_ref, lavg_ref):
        xs = xp_ref[0]                                   # (C, Hp, Wp) padded sample

        # Fused 3x3 conv stem + global average pool: only the 9 pooled window
        # sums per input channel are formed (pooling commutes with the conv).
        acc = jnp.zeros((1, C_FEAT), jnp.float32)
        for kh in range(3):
            m = jnp.sum(xs[:, kh:kh + H, :], axis=1)                 # (C, Wp)
            for kw in range(3):
                s = jnp.sum(m[:, kw:kw + W], axis=1, keepdims=True)  # (C, 1)
                acc = acc + jnp.sum(s * w9_ref[kh * 3 + kw],
                                    axis=0, keepdims=True)           # (1, 192)
        pooled = acc * inv_hw + bconv_ref[...]                       # (1, 192)

        # Leaky-integrate membrane recursion on the pooled state + classifier.
        mem = jnp.zeros((1, C_FEAT), jnp.float32)
        lsum = jnp.zeros((1, LANE), jnp.float32)
        for t in range(timestamp):
            mem = mem * DECAY + pooled                   # is_first handled by mem=0
            logit = jnp.dot(mem, wcls_ref[...],
                            preferred_element_type=jnp.float32) + bcls_ref[...]
            lpt_ref[:, t, :] = logit                     # lane-dense (1, 128) store
            lsum = lsum + logit
        lavg_ref[:, 0, :] = lsum * inv_t                 # time-average, in-kernel

    lpt_pad, lavg_pad = pl.pallas_call(
        kernel,
        out_shape=(
            jax.ShapeDtypeStruct((N, timestamp, LANE), jnp.float32),
            jax.ShapeDtypeStruct((N, 1, LANE), jnp.float32),
        ),
        grid_spec=pltpu.PrefetchScalarGridSpec(
            num_scalar_prefetch=0,
            grid=(N,),
            in_specs=[
                pl.BlockSpec((1, C_IN, Hp, Wp), lambda n: (n, 0, 0, 0)),
                pl.BlockSpec((9, C_IN, C_FEAT), lambda n: (0, 0, 0)),
                pl.BlockSpec((1, C_FEAT), lambda n: (0, 0)),
                pl.BlockSpec((C_FEAT, LANE), lambda n: (0, 0)),
                pl.BlockSpec((1, LANE), lambda n: (0, 0)),
            ],
            out_specs=[
                pl.BlockSpec((1, timestamp, LANE), lambda n: (n, 0, 0)),
                pl.BlockSpec((1, 1, LANE), lambda n: (n, 0, 0)),
            ],
        ),
        compiler_params=pltpu.CompilerParams(
            dimension_semantics=("parallel",),           # megacore on v7x
            vmem_limit_bytes=32 * 1024 * 1024,           # explicit, fits v7x 64MiB
        ),
    )(xp, w9, bconv, wcls, bcls)

    logits_per_time = lpt_pad[:, :, :N_CLASSES].transpose(1, 0, 2)   # (T, N, 10)
    logits = lavg_pad[:, 0, :N_CLASSES]                              # (N, 10)

    # TODO(synk): pruning / size / synops stats come from AutoFeature internals
    # that are not defined in the given source; returned as zeros.
    model_pruned_num = jnp.zeros((), jnp.float32)
    model_size = jnp.zeros((), jnp.float32)
    model_bit_synops_pertime = jnp.zeros((timestamp,), jnp.float32)
    model_bit_synops_total = jnp.sum(model_bit_synops_pertime, axis=0)

    return (logits_per_time, logits, model_pruned_num, model_size,
            model_bit_synops_pertime, model_bit_synops_total)


# ----------------------------------------------------------------------------
# Pure-JAX reference of the same stub semantics (for correctness check)
# ----------------------------------------------------------------------------
def reference_forward(x, conv_w, conv_b, cls_w, cls_b, timestamp=TIMESTAMP):
    feat = lax.conv_general_dilated(
        x, conv_w, window_strides=(1, 1), padding="SAME",
        dimension_numbers=("NCHW", "OIHW", "NCHW"),
    ) + conv_b[None, :, None, None]
    mem = jnp.zeros_like(feat)
    logits_pt = []
    for _ in range(timestamp):
        mem = mem * DECAY + feat
        pooled = jnp.mean(mem, axis=(2, 3))              # AdaptiveAvgPool2d(1)
        logits_pt.append(pooled @ cls_w.T + cls_b)       # Linear(192, 10)
    logits_pt = jnp.stack(logits_pt)
    return logits_pt, jnp.sum(logits_pt, axis=0) / timestamp


# ----------------------------------------------------------------------------
# Deterministic parameter init + smoke test
# ----------------------------------------------------------------------------
def init_params(key):
    k1, k2, k3, k4 = jax.random.split(key, 4)
    conv_w = jax.random.normal(k1, (C_FEAT, C_IN, 3, 3), jnp.float32) * 0.05
    conv_b = jax.random.normal(k2, (C_FEAT,), jnp.float32) * 0.01
    cls_w = jax.random.normal(k3, (N_CLASSES, C_FEAT), jnp.float32) * 0.05
    cls_b = jax.random.normal(k4, (N_CLASSES,), jnp.float32) * 0.01
    return conv_w, conv_b, cls_w, cls_b


if __name__ == "__main__":
    key = jax.random.PRNGKey(0)
    kx, kp = jax.random.split(key)
    x = jax.random.normal(kx, (2, C_IN, 16, 16), jnp.float32)    # NCHW input
    conv_w, conv_b, cls_w, cls_b = init_params(kp)

    outs = auto_stereo_forward(x, conv_w, conv_b, cls_w, cls_b, TIMESTAMP)
    outs = jax.block_until_ready(outs)
    logits_per_time, logits = outs[0], outs[1]

    assert logits_per_time.shape == (TIMESTAMP, 2, N_CLASSES)
    assert logits.shape == (2, N_CLASSES)
    assert bool(jnp.all(jnp.isfinite(logits)))

    ref_pt, ref_logits = reference_forward(x, conv_w, conv_b, cls_w, cls_b,
                                           TIMESTAMP)
    assert bool(jnp.allclose(logits_per_time, ref_pt, rtol=1e-3, atol=1e-4))
    assert bool(jnp.allclose(logits, ref_logits, rtol=1e-3, atol=1e-4))

    print("KERNEL_OK")
</pallas_src>

<mosaic_0001>
module attributes {stable_mosaic.version = 11 : i64} {
  func.func @kernel(%arg0: i32, %arg1: memref<1x3x18x18xf32, #tpu.memory_space<vmem>>, %arg2: memref<9x3x192xf32, #tpu.memory_space<vmem>>, %arg3: memref<1x192xf32, #tpu.memory_space<vmem>>, %arg4: memref<192x128xf32, #tpu.memory_space<vmem>>, %arg5: memref<1x128xf32, #tpu.memory_space<vmem>>, %arg6: memref<1x6x128xf32, #tpu.memory_space<vmem>>, %arg7: memref<1x1x128xf32, #tpu.memory_space<vmem>>) attributes {dimension_semantics = [#tpu.dimension_semantics<parallel>], iteration_bounds = array<i64: 2>, scalar_prefetch = 0 : i64, scratch_operands = 0 : i64, tpu.core_type = #tpu.core_type<tc>, window_params = [{transform_indices = @transform_0, window_bounds = array<i64: 1, 3, 18, 18>}, {pipeline_mode = #tpu.pipeline_mode<synchronous>, transform_indices = @transform_1, window_bounds = array<i64: 9, 3, 192>}, {pipeline_mode = #tpu.pipeline_mode<synchronous>, transform_indices = @transform_2, window_bounds = array<i64: 1, 192>}, {pipeline_mode = #tpu.pipeline_mode<synchronous>, transform_indices = @transform_3, window_bounds = array<i64: 192, 128>}, {pipeline_mode = #tpu.pipeline_mode<synchronous>, transform_indices = @transform_4, window_bounds = array<i64: 1, 128>}, {transform_indices = @transform_5, window_bounds = array<i64: 1, 6, 128>}, {transform_indices = @transform_6, window_bounds = array<i64: 1, 1, 128>}]} {
    %c0 = arith.constant 0 : index
    %c0_0 = arith.constant 0 : index
    %c0_1 = arith.constant 0 : index
    %c0_2 = arith.constant 0 : index
    %0 = vector.load %arg1[%c0, %c0_0, %c0_1, %c0_2] : memref<1x3x18x18xf32, #tpu.memory_space<vmem>>, vector<1x3x18x18xf32>
    %1 = vector.shape_cast %0 : vector<1x3x18x18xf32> to vector<3x18x18xf32>
    %cst = arith.constant 0.000000e+00 : f32
    %2 = vector.broadcast %cst : f32 to vector<1x192xf32>
    %3 = vector.extract_strided_slice %1 {offsets = [0, 0, 0], sizes = [3, 16, 18], strides = [1, 1, 1]} : vector<3x18x18xf32> to vector<3x16x18xf32>
    %cst_3 = arith.constant dense<0.000000e+00> : vector<3x18xf32>
    %4 = vector.multi_reduction <add>, %3, %cst_3 [1] : vector<3x16x18xf32> to vector<3x18xf32>
    %5 = vector.extract_strided_slice %4 {offsets = [0, 0], sizes = [3, 16], strides = [1, 1]} : vector<3x18xf32> to vector<3x16xf32>
    %cst_4 = arith.constant dense<0.000000e+00> : vector<3xf32>
    %6 = vector.multi_reduction <add>, %5, %cst_4 [1] : vector<3x16xf32> to vector<3xf32>
    %7 = vector.shape_cast %6 : vector<3xf32> to vector<3x1xf32>
    %c0_5 = arith.constant 0 : index
    %c0_6 = arith.constant 0 : index
    %c0_7 = arith.constant 0 : index
    %8 = vector.load %arg2[%c0_5, %c0_6, %c0_7] : memref<9x3x192xf32, #tpu.memory_space<vmem>>, vector<1x3x192xf32>
    %9 = vector.shape_cast %8 : vector<1x3x192xf32> to vector<3x192xf32>
    %10 = vector.broadcast %7 : vector<3x1xf32> to vector<3x192xf32>
    %11 = arith.mulf %10, %9 : vector<3x192xf32>
    %cst_8 = arith.constant dense<0.000000e+00> : vector<192xf32>
    %12 = vector.multi_reduction <add>, %11, %cst_8 [0] : vector<3x192xf32> to vector<192xf32>
    %13 = vector.shape_cast %12 : vector<192xf32> to vector<1x192xf32>
    %14 = arith.addf %2, %13 : vector<1x192xf32>
    %15 = vector.extract_strided_slice %4 {offsets = [0, 1], sizes = [3, 16], strides = [1, 1]} : vector<3x18xf32> to vector<3x16xf32>
    %cst_9 = arith.constant dense<0.000000e+00> : vector<3xf32>
    %16 = vector.multi_reduction <add>, %15, %cst_9 [1] : vector<3x16xf32> to vector<3xf32>
    %17 = vector.shape_cast %16 : vector<3xf32> to vector<3x1xf32>
    %c1 = arith.constant 1 : index
    %c0_10 = arith.constant 0 : index
    %c0_11 = arith.constant 0 : index
    %18 = vector.load %arg2[%c1, %c0_10, %c0_11] : memref<9x3x192xf32, #tpu.memory_space<vmem>>, vector<1x3x192xf32>
    %19 = vector.shape_cast %18 : vector<1x3x192xf32> to vector<3x192xf32>
    %20 = vector.broadcast %17 : vector<3x1xf32> to vector<3x192xf32>
    %21 = arith.mulf %20, %19 : vector<3x192xf32>
    %cst_12 = arith.constant dense<0.000000e+00> : vector<192xf32>
    %22 = vector.multi_reduction <add>, %21, %cst_12 [0] : vector<3x192xf32> to vector<192xf32>
    %23 = vector.shape_cast %22 : vector<192xf32> to vector<1x192xf32>
    %24 = arith.addf %14, %23 : vector<1x192xf32>
    %25 = vector.extract_strided_slice %4 {offsets = [0, 2], sizes = [3, 16], strides = [1, 1]} : vector<3x18xf32> to vector<3x16xf32>
    %cst_13 = arith.constant dense<0.000000e+00> : vector<3xf32>
    %26 = vector.multi_reduction <add>, %25, %cst_13 [1] : vector<3x16xf32> to vector<3xf32>
    %27 = vector.shape_cast %26 : vector<3xf32> to vector<3x1xf32>
    %c2 = arith.constant 2 : index
    %c0_14 = arith.constant 0 : index
    %c0_15 = arith.constant 0 : index
    %28 = vector.load %arg2[%c2, %c0_14, %c0_15] : memref<9x3x192xf32, #tpu.memory_space<vmem>>, vector<1x3x192xf32>
    %29 = vector.shape_cast %28 : vector<1x3x192xf32> to vector<3x192xf32>
    %30 = vector.broadcast %27 : vector<3x1xf32> to vector<3x192xf32>
    %31 = arith.mulf %30, %29 : vector<3x192xf32>
    %cst_16 = arith.constant dense<0.000000e+00> : vector<192xf32>
    %32 = vector.multi_reduction <add>, %31, %cst_16 [0] : vector<3x192xf32> to vector<192xf32>
    %33 = vector.shape_cast %32 : vector<192xf32> to vector<1x192xf32>
    %34 = arith.addf %24, %33 : vector<1x192xf32>
    %35 = vector.extract_strided_slice %1 {offsets = [0, 1, 0], sizes = [3, 16, 18], strides = [1, 1, 1]} : vector<3x18x18xf32> to vector<3x16x18xf32>
    %cst_17 = arith.constant dense<0.000000e+00> : vector<3x18xf32>
    %36 = vector.multi_reduction <add>, %35, %cst_17 [1] : vector<3x16x18xf32> to vector<3x18xf32>
    %37 = vector.extract_strided_slice %36 {offsets = [0, 0], sizes = [3, 16], strides = [1, 1]} : vector<3x18xf32> to vector<3x16xf32>
    %cst_18 = arith.constant dense<0.000000e+00> : vector<3xf32>
    %38 = vector.multi_reduction <add>, %37, %cst_18 [1] : vector<3x16xf32> to vector<3xf32>
    %39 = vector.shape_cast %38 : vector<3xf32> to vector<3x1xf32>
    %c3 = arith.constant 3 : index
    %c0_19 = arith.constant 0 : index
    %c0_20 = arith.constant 0 : index
    %40 = vector.load %arg2[%c3, %c0_19, %c0_20] : memref<9x3x192xf32, #tpu.memory_space<vmem>>, vector<1x3x192xf32>
    %41 = vector.shape_cast %40 : vector<1x3x192xf32> to vector<3x192xf32>
    %42 = vector.broadcast %39 : vector<3x1xf32> to vector<3x192xf32>
    %43 = arith.mulf %42, %41 : vector<3x192xf32>
    %cst_21 = arith.constant dense<0.000000e+00> : vector<192xf32>
    %44 = vector.multi_reduction <add>, %43, %cst_21 [0] : vector<3x192xf32> to vector<192xf32>
    %45 = vector.shape_cast %44 : vector<192xf32> to vector<1x192xf32>
    %46 = arith.addf %34, %45 : vector<1x192xf32>
    %47 = vector.extract_strided_slice %36 {offsets = [0, 1], sizes = [3, 16], strides = [1, 1]} : vector<3x18xf32> to vector<3x16xf32>
    %cst_22 = arith.constant dense<0.000000e+00> : vector<3xf32>
    %48 = vector.multi_reduction <add>, %47, %cst_22 [1] : vector<3x16xf32> to vector<3xf32>
    %49 = vector.shape_cast %48 : vector<3xf32> to vector<3x1xf32>
    %c4 = arith.constant 4 : index
    %c0_23 = arith.constant 0 : index
    %c0_24 = arith.constant 0 : index
    %50 = vector.load %arg2[%c4, %c0_23, %c0_24] : memref<9x3x192xf32, #tpu.memory_space<vmem>>, vector<1x3x192xf32>
    %51 = vector.shape_cast %50 : vector<1x3x192xf32> to vector<3x192xf32>
    %52 = vector.broadcast %49 : vector<3x1xf32> to vector<3x192xf32>
    %53 = arith.mulf %52, %51 : vector<3x192xf32>
    %cst_25 = arith.constant dense<0.000000e+00> : vector<192xf32>
    %54 = vector.multi_reduction <add>, %53, %cst_25 [0] : vector<3x192xf32> to vector<192xf32>
    %55 = vector.shape_cast %54 : vector<192xf32> to vector<1x192xf32>
    %56 = arith.addf %46, %55 : vector<1x192xf32>
    %57 = vector.extract_strided_slice %36 {offsets = [0, 2], sizes = [3, 16], strides = [1, 1]} : vector<3x18xf32> to vector<3x16xf32>
    %cst_26 = arith.constant dense<0.000000e+00> : vector<3xf32>
    %58 = vector.multi_reduction <add>, %57, %cst_26 [1] : vector<3x16xf32> to vector<3xf32>
    %59 = vector.shape_cast %58 : vector<3xf32> to vector<3x1xf32>
    %c5 = arith.constant 5 : index
    %c0_27 = arith.constant 0 : index
    %c0_28 = arith.constant 0 : index
    %60 = vector.load %arg2[%c5, %c0_27, %c0_28] : memref<9x3x192xf32, #tpu.memory_space<vmem>>, vector<1x3x192xf32>
    %61 = vector.shape_cast %60 : vector<1x3x192xf32> to vector<3x192xf32>
    %62 = vector.broadcast %59 : vector<3x1xf32> to vector<3x192xf32>
    %63 = arith.mulf %62, %61 : vector<3x192xf32>
    %cst_29 = arith.constant dense<0.000000e+00> : vector<192xf32>
    %64 = vector.multi_reduction <add>, %63, %cst_29 [0] : vector<3x192xf32> to vector<192xf32>
    %65 = vector.shape_cast %64 : vector<192xf32> to vector<1x192xf32>
    %66 = arith.addf %56, %65 : vector<1x192xf32>
    %67 = vector.extract_strided_slice %1 {offsets = [0, 2, 0], sizes = [3, 16, 18], strides = [1, 1, 1]} : vector<3x18x18xf32> to vector<3x16x18xf32>
    %cst_30 = arith.constant dense<0.000000e+00> : vector<3x18xf32>
    %68 = vector.multi_reduction <add>, %67, %cst_30 [1] : vector<3x16x18xf32> to vector<3x18xf32>
    %69 = vector.extract_strided_slice %68 {offsets = [0, 0], sizes = [3, 16], strides = [1, 1]} : vector<3x18xf32> to vector<3x16xf32>
    %cst_31 = arith.constant dense<0.000000e+00> : vector<3xf32>
    %70 = vector.multi_reduction <add>, %69, %cst_31 [1] : vector<3x16xf32> to vector<3xf32>
    %71 = vector.shape_cast %70 : vector<3xf32> to vector<3x1xf32>
    %c6 = arith.constant 6 : index
    %c0_32 = arith.constant 0 : index
    %c0_33 = arith.constant 0 : index
    %72 = vector.load %arg2[%c6, %c0_32, %c0_33] : memref<9x3x192xf32, #tpu.memory_space<vmem>>, vector<1x3x192xf32>
    %73 = vector.shape_cast %72 : vector<1x3x192xf32> to vector<3x192xf32>
    %74 = vector.broadcast %71 : vector<3x1xf32> to vector<3x192xf32>
    %75 = arith.mulf %74, %73 : vector<3x192xf32>
    %cst_34 = arith.constant dense<0.000000e+00> : vector<192xf32>
    %76 = vector.multi_reduction <add>, %75, %cst_34 [0] : vector<3x192xf32> to vector<192xf32>
    %77 = vector.shape_cast %76 : vector<192xf32> to vector<1x192xf32>
    %78 = arith.addf %66, %77 : vector<1x192xf32>
    %79 = vector.extract_strided_slice %68 {offsets = [0, 1], sizes = [3, 16], strides = [1, 1]} : vector<3x18xf32> to vector<3x16xf32>
    %cst_35 = arith.constant dense<0.000000e+00> : vector<3xf32>
    %80 = vector.multi_reduction <add>, %79, %cst_35 [1] : vector<3x16xf32> to vector<3xf32>
    %81 = vector.shape_cast %80 : vector<3xf32> to vector<3x1xf32>
    %c7 = arith.constant 7 : index
    %c0_36 = arith.constant 0 : index
    %c0_37 = arith.constant 0 : index
    %82 = vector.load %arg2[%c7, %c0_36, %c0_37] : memref<9x3x192xf32, #tpu.memory_space<vmem>>, vector<1x3x192xf32>
    %83 = vector.shape_cast %82 : vector<1x3x192xf32> to vector<3x192xf32>
    %84 = vector.broadcast %81 : vector<3x1xf32> to vector<3x192xf32>
    %85 = arith.mulf %84, %83 : vector<3x192xf32>
    %cst_38 = arith.constant dense<0.000000e+00> : vector<192xf32>
    %86 = vector.multi_reduction <add>, %85, %cst_38 [0] : vector<3x192xf32> to vector<192xf32>
    %87 = vector.shape_cast %86 : vector<192xf32> to vector<1x192xf32>
    %88 = arith.addf %78, %87 : vector<1x192xf32>
    %89 = vector.extract_strided_slice %68 {offsets = [0, 2], sizes = [3, 16], strides = [1, 1]} : vector<3x18xf32> to vector<3x16xf32>
    %cst_39 = arith.constant dense<0.000000e+00> : vector<3xf32>
    %90 = vector.multi_reduction <add>, %89, %cst_39 [1] : vector<3x16xf32> to vector<3xf32>
    %91 = vector.shape_cast %90 : vector<3xf32> to vector<3x1xf32>
    %c8 = arith.constant 8 : index
    %c0_40 = arith.constant 0 : index
    %c0_41 = arith.constant 0 : index
    %92 = vector.load %arg2[%c8, %c0_40, %c0_41] : memref<9x3x192xf32, #tpu.memory_space<vmem>>, vector<1x3x192xf32>
    %93 = vector.shape_cast %92 : vector<1x3x192xf32> to vector<3x192xf32>
    %94 = vector.broadcast %91 : vector<3x1xf32> to vector<3x192xf32>
    %95 = arith.mulf %94, %93 : vector<3x192xf32>
    %cst_42 = arith.constant dense<0.000000e+00> : vector<192xf32>
    %96 = vector.multi_reduction <add>, %95, %cst_42 [0] : vector<3x192xf32> to vector<192xf32>
    %97 = vector.shape_cast %96 : vector<192xf32> to vector<1x192xf32>
    %98 = arith.addf %88, %97 : vector<1x192xf32>
    %cst_43 = arith.constant 3.906250e-03 : f32
    %99 = vector.broadcast %cst_43 : f32 to vector<1x192xf32>
    %100 = arith.mulf %98, %99 : vector<1x192xf32>
    %c0_44 = arith.constant 0 : index
    %c0_45 = arith.constant 0 : index
    %101 = vector.load %arg3[%c0_44, %c0_45] : memref<1x192xf32, #tpu.memory_space<vmem>>, vector<1x192xf32>
    %102 = arith.addf %100, %101 : vector<1x192xf32>
    %cst_46 = arith.constant 0.000000e+00 : f32
    %103 = vector.broadcast %cst_46 : f32 to vector<1x192xf32>
    %cst_47 = arith.constant 0.000000e+00 : f32
    %104 = vector.broadcast %cst_47 : f32 to vector<1x128xf32>
    %cst_48 = arith.constant 2.000000e-01 : f32
    %105 = vector.broadcast %cst_48 : f32 to vector<1x192xf32>
    %106 = arith.mulf %103, %105 : vector<1x192xf32>
    %107 = arith.addf %106, %102 : vector<1x192xf32>
    %c0_49 = arith.constant 0 : index
    %c0_50 = arith.constant 0 : index
    %108 = vector.load %arg4[%c0_49, %c0_50] : memref<192x128xf32, #tpu.memory_space<vmem>>, vector<192x128xf32>
    %cst_51 = arith.constant dense<0.000000e+00> : vector<1x128xf32>
    %109 = tpu.matmul %107, %108, %cst_51 {dimension_numbers = #tpu.dot_dimension_numbers<[1], [0], [0], [1], [0, 0, 1, 1], [], []>} : vector<1x192xf32>, vector<192x128xf32>, vector<1x128xf32> -> vector<1x128xf32>
    %c0_52 = arith.constant 0 : index
    %c0_53 = arith.constant 0 : index
    %110 = vector.load %arg5[%c0_52, %c0_53] : memref<1x128xf32, #tpu.memory_space<vmem>>, vector<1x128xf32>
    %111 = arith.addf %109, %110 : vector<1x128xf32>
    %c0_54 = arith.constant 0 : index
    %c0_55 = arith.constant 0 : index
    %c0_56 = arith.constant 0 : index
    %112 = vector.load %arg6[%c0_54, %c0_55, %c0_56] : memref<1x6x128xf32, #tpu.memory_space<vmem>>, vector<1x1x128xf32>
    %113 = vector.shape_cast %112 : vector<1x1x128xf32> to vector<1x128xf32>
    %114 = vector.shape_cast %111 : vector<1x128xf32> to vector<1x1x128xf32>
    tpu.vector_store %arg6[%c0_54, %c0_55, %c0_56], %114 {strides = array<i32>} : memref<1x6x128xf32, #tpu.memory_space<vmem>>, vector<1x1x128xf32>,
    %115 = arith.addf %104, %111 : vector<1x128xf32>
    %cst_57 = arith.constant 2.000000e-01 : f32
    %116 = vector.broadcast %cst_57 : f32 to vector<1x192xf32>
    %117 = arith.mulf %107, %116 : vector<1x192xf32>
    %118 = arith.addf %117, %102 : vector<1x192xf32>
    %c0_58 = arith.constant 0 : index
    %c0_59 = arith.constant 0 : index
    %119 = vector.load %arg4[%c0_58, %c0_59] : memref<192x128xf32, #tpu.memory_space<vmem>>, vector<192x128xf32>
    %cst_60 = arith.constant dense<0.000000e+00> : vector<1x128xf32>
    %120 = tpu.matmul %118, %119, %cst_60 {dimension_numbers = #tpu.dot_dimension_numbers<[1], [0], [0], [1], [0, 0, 1, 1], [], []>} : vector<1x192xf32>, vector<192x128xf32>, vector<1x128xf32> -> vector<1x128xf32>
    %c0_61 = arith.constant 0 : index
    %c0_62 = arith.constant 0 : index
    %121 = vector.load %arg5[%c0_61, %c0_62] : memref<1x128xf32, #tpu.memory_space<vmem>>, vector<1x128xf32>
    %122 = arith.addf %120, %121 : vector<1x128xf32>
    %c0_63 = arith.constant 0 : index
    %c1_64 = arith.constant 1 : index
    %c0_65 = arith.constant 0 : index
    %123 = vector.load %arg6[%c0_63, %c1_64, %c0_65] : memref<1x6x128xf32, #tpu.memory_space<vmem>>, vector<1x1x128xf32>
    %124 = vector.shape_cast %123 : vector<1x1x128xf32> to vector<1x128xf32>
    %125 = vector.shape_cast %122 : vector<1x128xf32> to vector<1x1x128xf32>
    tpu.vector_store %arg6[%c0_63, %c1_64, %c0_65], %125 {strides = array<i32>} : memref<1x6x128xf32, #tpu.memory_space<vmem>>, vector<1x1x128xf32>,
    %126 = arith.addf %115, %122 : vector<1x128xf32>
    %cst_66 = arith.constant 2.000000e-01 : f32
    %127 = vector.broadcast %cst_66 : f32 to vector<1x192xf32>
    %128 = arith.mulf %118, %127 : vector<1x192xf32>
    %129 = arith.addf %128, %102 : vector<1x192xf32>
    %c0_67 = arith.constant 0 : index
    %c0_68 = arith.constant 0 : index
    %130 = vector.load %arg4[%c0_67, %c0_68] : memref<192x128xf32, #tpu.memory_space<vmem>>, vector<192x128xf32>
    %cst_69 = arith.constant dense<0.000000e+00> : vector<1x128xf32>
    %131 = tpu.matmul %129, %130, %cst_69 {dimension_numbers = #tpu.dot_dimension_numbers<[1], [0], [0], [1], [0, 0, 1, 1], [], []>} : vector<1x192xf32>, vector<192x128xf32>, vector<1x128xf32> -> vector<1x128xf32>
    %c0_70 = arith.constant 0 : index
    %c0_71 = arith.constant 0 : index
    %132 = vector.load %arg5[%c0_70, %c0_71] : memref<1x128xf32, #tpu.memory_space<vmem>>, vector<1x128xf32>
    %133 = arith.addf %131, %132 : vector<1x128xf32>
    %c0_72 = arith.constant 0 : index
    %c2_73 = arith.constant 2 : index
    %c0_74 = arith.constant 0 : index
    %134 = vector.load %arg6[%c0_72, %c2_73, %c0_74] : memref<1x6x128xf32, #tpu.memory_space<vmem>>, vector<1x1x128xf32>
    %135 = vector.shape_cast %134 : vector<1x1x128xf32> to vector<1x128xf32>
    %136 = vector.shape_cast %133 : vector<1x128xf32> to vector<1x1x128xf32>
    tpu.vector_store %arg6[%c0_72, %c2_73, %c0_74], %136 {strides = array<i32>} : memref<1x6x128xf32, #tpu.memory_space<vmem>>, vector<1x1x128xf32>,
    %137 = arith.addf %126, %133 : vector<1x128xf32>
    %cst_75 = arith.constant 2.000000e-01 : f32
    %138 = vector.broadcast %cst_75 : f32 to vector<1x192xf32>
    %139 = arith.mulf %129, %138 : vector<1x192xf32>
    %140 = arith.addf %139, %102 : vector<1x192xf32>
    %c0_76 = arith.constant 0 : index
    %c0_77 = arith.constant 0 : index
    %141 = vector.load %arg4[%c0_76, %c0_77] : memref<192x128xf32, #tpu.memory_space<vmem>>, vector<192x128xf32>
    %cst_78 = arith.constant dense<0.000000e+00> : vector<1x128xf32>
    %142 = tpu.matmul %140, %141, %cst_78 {dimension_numbers = #tpu.dot_dimension_numbers<[1], [0], [0], [1], [0, 0, 1, 1], [], []>} : vector<1x192xf32>, vector<192x128xf32>, vector<1x128xf32> -> vector<1x128xf32>
    %c0_79 = arith.constant 0 : index
    %c0_80 = arith.constant 0 : index
    %143 = vector.load %arg5[%c0_79, %c0_80] : memref<1x128xf32, #tpu.memory_space<vmem>>, vector<1x128xf32>
    %144 = arith.addf %142, %143 : vector<1x128xf32>
    %c0_81 = arith.constant 0 : index
    %c3_82 = arith.constant 3 : index
    %c0_83 = arith.constant 0 : index
    %145 = vector.load %arg6[%c0_81, %c3_82, %c0_83] : memref<1x6x128xf32, #tpu.memory_space<vmem>>, vector<1x1x128xf32>
    %146 = vector.shape_cast %145 : vector<1x1x128xf32> to vector<1x128xf32>
    %147 = vector.shape_cast %144 : vector<1x128xf32> to vector<1x1x128xf32>
    tpu.vector_store %arg6[%c0_81, %c3_82, %c0_83], %147 {strides = array<i32>} : memref<1x6x128xf32, #tpu.memory_space<vmem>>, vector<1x1x128xf32>,
    %148 = arith.addf %137, %144 : vector<1x128xf32>
    %cst_84 = arith.constant 2.000000e-01 : f32
    %149 = vector.broadcast %cst_84 : f32 to vector<1x192xf32>
    %150 = arith.mulf %140, %149 : vector<1x192xf32>
    %151 = arith.addf %150, %102 : vector<1x192xf32>
    %c0_85 = arith.constant 0 : index
    %c0_86 = arith.constant 0 : index
    %152 = vector.load %arg4[%c0_85, %c0_86] : memref<192x128xf32, #tpu.memory_space<vmem>>, vector<192x128xf32>
    %cst_87 = arith.constant dense<0.000000e+00> : vector<1x128xf32>
    %153 = tpu.matmul %151, %152, %cst_87 {dimension_numbers = #tpu.dot_dimension_numbers<[1], [0], [0], [1], [0, 0, 1, 1], [], []>} : vector<1x192xf32>, vector<192x128xf32>, vector<1x128xf32> -> vector<1x128xf32>
    %c0_88 = arith.constant 0 : index
    %c0_89 = arith.constant 0 : index
    %154 = vector.load %arg5[%c0_88, %c0_89] : memref<1x128xf32, #tpu.memory_space<vmem>>, vector<1x128xf32>
    %155 = arith.addf %153, %154 : vector<1x128xf32>
    %c0_90 = arith.constant 0 : index
    %c4_91 = arith.constant 4 : index
    %c0_92 = arith.constant 0 : index
    %156 = vector.load %arg6[%c0_90, %c4_91, %c0_92] : memref<1x6x128xf32, #tpu.memory_space<vmem>>, vector<1x1x128xf32>
    %157 = vector.shape_cast %156 : vector<1x1x128xf32> to vector<1x128xf32>
    %158 = vector.shape_cast %155 : vector<1x128xf32> to vector<1x1x128xf32>
    tpu.vector_store %arg6[%c0_90, %c4_91, %c0_92], %158 {strides = array<i32>} : memref<1x6x128xf32, #tpu.memory_space<vmem>>, vector<1x1x128xf32>,
    %159 = arith.addf %148, %155 : vector<1x128xf32>
    %cst_93 = arith.constant 2.000000e-01 : f32
    %160 = vector.broadcast %cst_93 : f32 to vector<1x192xf32>
    %161 = arith.mulf %151, %160 : vector<1x192xf32>
    %162 = arith.addf %161, %102 : vector<1x192xf32>
    %c0_94 = arith.constant 0 : index
    %c0_95 = arith.constant 0 : index
    %163 = vector.load %arg4[%c0_94, %c0_95] : memref<192x128xf32, #tpu.memory_space<vmem>>, vector<192x128xf32>
    %cst_96 = arith.constant dense<0.000000e+00> : vector<1x128xf32>
    %164 = tpu.matmul %162, %163, %cst_96 {dimension_numbers = #tpu.dot_dimension_numbers<[1], [0], [0], [1], [0, 0, 1, 1], [], []>} : vector<1x192xf32>, vector<192x128xf32>, vector<1x128xf32> -> vector<1x128xf32>
    %c0_97 = arith.constant 0 : index
    %c0_98 = arith.constant 0 : index
    %165 = vector.load %arg5[%c0_97, %c0_98] : memref<1x128xf32, #tpu.memory_space<vmem>>, vector<1x128xf32>
    %166 = arith.addf %164, %165 : vector<1x128xf32>
    %c0_99 = arith.constant 0 : index
    %c5_100 = arith.constant 5 : index
    %c0_101 = arith.constant 0 : index
    %167 = vector.load %arg6[%c0_99, %c5_100, %c0_101] : memref<1x6x128xf32, #tpu.memory_space<vmem>>, vector<1x1x128xf32>
    %168 = vector.shape_cast %167 : vector<1x1x128xf32> to vector<1x128xf32>
    %169 = vector.shape_cast %166 : vector<1x128xf32> to vector<1x1x128xf32>
    tpu.vector_store %arg6[%c0_99, %c5_100, %c0_101], %169 {strides = array<i32>} : memref<1x6x128xf32, #tpu.memory_space<vmem>>, vector<1x1x128xf32>,
    %170 = arith.addf %159, %166 : vector<1x128xf32>
    %cst_102 = arith.constant 0.166666672 : f32
    %171 = vector.broadcast %cst_102 : f32 to vector<1x128xf32>
    %172 = arith.mulf %170, %171 : vector<1x128xf32>
    %c0_103 = arith.constant 0 : index
    %c0_104 = arith.constant 0 : index
    %c0_105 = arith.constant 0 : index
    %173 = vector.load %arg7[%c0_103, %c0_104, %c0_105] : memref<1x1x128xf32, #tpu.memory_space<vmem>>, vector<1x1x128xf32>
    %174 = vector.shape_cast %173 : vector<1x1x128xf32> to vector<1x128xf32>
    %175 = vector.shape_cast %172 : vector<1x128xf32> to vector<1x1x128xf32>
    tpu.vector_store %arg7[%c0_103, %c0_104, %c0_105], %175 {strides = array<i32>} : memref<1x1x128xf32, #tpu.memory_space<vmem>>, vector<1x1x128xf32>,
    return
  }
  func.func @transform_0(%arg0: i32) -> (i32, i32, i32, i32) {
    %c0_i32 = arith.constant 0 : i32
    %c0_i32_0 = arith.constant 0 : i32
    %c0_i32_1 = arith.constant 0 : i32
    %c0_i32_2 = arith.constant 0 : i32
    return %arg0, %c0_i32, %c0_i32_0, %c0_i32_1 : i32, i32, i32, i32
  }
  func.func @transform_1(%arg0: i32) -> (i32, i32, i32) {
    %c0_i32 = arith.constant 0 : i32
    %c0_i32_0 = arith.constant 0 : i32
    %c0_i32_1 = arith.constant 0 : i32
    %c0_i32_2 = arith.constant 0 : i32
    return %c0_i32, %c0_i32_0, %c0_i32_1 : i32, i32, i32
  }
  func.func @transform_2(%arg0: i32) -> (i32, i32) {
    %c0_i32 = arith.constant 0 : i32
    %c0_i32_0 = arith.constant 0 : i32
    %c0_i32_1 = arith.constant 0 : i32
    return %c0_i32, %c0_i32_0 : i32, i32
  }
  func.func @transform_3(%arg0: i32) -> (i32, i32) {
    %c0_i32 = arith.constant 0 : i32
    %c0_i32_0 = arith.constant 0 : i32
    %c0_i32_1 = arith.constant 0 : i32
    return %c0_i32, %c0_i32_0 : i32, i32
  }
  func.func @transform_4(%arg0: i32) -> (i32, i32) {
    %c0_i32 = arith.constant 0 : i32
    %c0_i32_0 = arith.constant 0 : i32
    %c0_i32_1 = arith.constant 0 : i32
    return %c0_i32, %c0_i32_0 : i32, i32
  }
  func.func @transform_5(%arg0: i32) -> (i32, i32, i32) {
    %c0_i32 = arith.constant 0 : i32
    %c0_i32_0 = arith.constant 0 : i32
    %c0_i32_1 = arith.constant 0 : i32
    return %arg0, %c0_i32, %c0_i32_0 : i32, i32, i32
  }
  func.func @transform_6(%arg0: i32) -> (i32, i32, i32) {
    %c0_i32 = arith.constant 0 : i32
    %c0_i32_0 = arith.constant 0 : i32
    %c0_i32_1 = arith.constant 0 : i32
    return %arg0, %c0_i32, %c0_i32_0 : i32, i32, i32
  }
}

</mosaic_0001>

<bundles_post_ra>
// kernel: tpu_custom_call.1
= control target key start
LH: loop header
LB: loop body
LE: loop exit
PB: predicated region body
PF: predicated region fallthrough
CT: control target
= control target key end

     0   :  { %12 = vsyncpa [#allocation3], 0  ;;  %s2056_s0 = inlined_call_operand.vmem [shape: f32[2,3,18,18], index: 0, kind: input, shape index: {}]   ;;  %s2057_s1 = inlined_call_operand.hbm [shape: f32[9,3,192], index: 1, kind: input, shape index: {}]   ;;  %s2058_s2 = inlined_call_operand.vmem [shape: f32[1,192], index: 2, kind: input, shape index: {}]   ;;  %s2059_s3 = inlined_call_operand.vmem [shape: f32[192,128], index: 3, kind: input, shape index: {}]   ;;  %s2060_s4 = inlined_call_operand.vmem [shape: f32[1,128], index: 4, kind: input, shape index: {}]   ;;  %s2061_s5 = inlined_call_operand.vmem [shape: f32[2,6,128], index: 5, kind: output, shape index: {0}]   ;;  %s2062_s6 = inlined_call_operand.hbm [shape: f32[2,1,128], index: 6, kind: output, shape index: {1}]  }
   0x1   :  { %13 = vsyncpa [#allocation4], 0 }
   0x2   :  { %15 = vsyncpa [#allocation4 + $0x1], 0  ;;  %s1497_s21 = smov 0   ;;  %s1499_s22 = smov 0  }
   0x3   :  { %s1501_s23 = smov 0   ;;  %s1503_s24 = smov 0  }
   0x4 LB: > { %s1518_s25 = sadd.s32 4294967295, %s1455_s24   ;;  %s1288_s26 = sadd.s32 4294967294, %s1455_s24   ;;  %s1455_s24 = sphi %s1503_s24, %s2068_s24   ;;  %s1451_s23 = sphi %s1501_s23, %s2067_s23   ;;  %s1447_s22 = sphi %s1499_s22, %s2066_s22   ;;  %s1443_s21 = sphi %s1497_s21, %s2065_s21  }
   0x5   : > { %s1522_s27 = sadd.s32 1, %s1455_s24   ;;  %s164_s28 = sadd.s32 1, %s1451_s23 }
   0x6   : > { %s161_s29 = ssub.s32 %s1455_s24, %s1522_s27  ;;  %p174_p0 = scmp.ne.s32.totalorder %s1451_s23, %s1447_s22 }
   0x7   : > { %p162_p1 = scmp.eq.s32.totalorder %s161_s29, 0  ;;  %p175_p2 = scmp.eq.s32.totalorder %s1518_s25, 1 }
   0x8   : > { %p180_p3 = scmp.ne.s32.totalorder %s1447_s22, %s1443_s21  ;;  %p181_p4 = scmp.eq.s32.totalorder %s1288_s26, 1 }
   0x9   : > { %s1533_s30 = scalar_select %p162_p1, %s1451_s23, %s164_s28  }
   0xa   : > { %p1535_p5 = por %p175_p2, %p174_p0  ;;  %p1539_p6 = por %p181_p4, %p180_p3 }
   0xb   : > { %p1289_p7 = scmp.ge.s32.totalorder %s1455_s24, 1  ;;  %p188_p8 = scmp.lt.s32.totalorder %s1455_s24, 3 }
   0xc   : > { %p1319_p9 = scmp.eq.s32.totalorder %s1518_s25, 0  ;;  %s199_s11 = sshll.u32 %s2057_s1, 4  ;;  %s200_s11 = int_to_ptr.hbm [resolvable:$true] %s199_s11 }
   0xd   : > { %p189_p10 = pnand %p1289_p7, %p188_p8  ;;  %s1457_s12 = smov [#allocation2]  }
   0xe   : > { %s201_s13 = sshll.u32 %s1457_s12, 4  ;;  %s1458_s14 = smov 128   ;;  %s202_s13 = int_to_ptr.vmem [resolvable:$true] %s201_s13 }
   0xf   : > { %p1311_p11 = pneg %p189_p10  ;;  %s1459_s15 = smov 8  }
  0x10   : > { %234 = sbr.rel (%p189_p10) target bundleno = 513 (0x201), region = 40 }
  0x11   : > { %p1312_p12 = pnand %p1319_p9, %p1311_p11 }
  0x13   : > { %1314 = dma.hbm_to_vmem [thread:$0]  (!%p1312_p12), %s200_s11, 1152, %s202_s13, [#allocation3], %s1458_s14, %s1458_s14, %s1459_s15  }
  0x15   : > { %1434 = dma.done.wait (%p1319_p9), [#allocation3], 1152  }
  0x16   : > { %1436 = vsyncadd (%p1319_p9), [#allocation3], 4294966144  ;;  %p268_p13 = scmp.lt.s32.totalorder %s1518_s25, 1  ;;  %vm286_vm0 = vcmask 146432   ;;  %vm426_vm1 = vcmask 1046528   ;;  %vm317_vm2 = vcmask 1041409  }
  0x17   : > { %vm319_vm3 = vcmask 1042434   ;;  %vm574_vm4 = vcmask 1045504   ;;  %s1460_s26 = smov 127   ;;  %s1461_s28 = smov 126   ;;  %vm322_vm5 = vcmask 124928   ;;  %vm335_vm6 = vcmask 1042432  }
  0x18   : > { %s1557_s16 = scalar_select %p268_p13, %s1518_s25, 1  ;;  %vm343_vm7 = vcmask 518144   ;;  %vm759_vm8 = vcmask 523264  }
  0x19   : > { %s266_s18 = sand.u32 1, %s1447_s22  }
  0x1a   : > { %s1304_s17 = smul.u32 72, %s1557_s16  ;;  %s1295_s19 = sshll.u32 %s1557_s16, 3 }
  0x1b   : > { %s267_s29 = scalar_lea.vmem [#allocation5], %s266_s18  ;;  %s1182_s10 = scalar_lea.sflag [#allocation4], %s266_s18 }
  0x1c   : > { %s1563_s20 = scalar_lea.vmem %s2056_s0, %s1304_s17  ;;  %s1195_s9 = sshll.u32 %s267_s29, 4  ;;  %s1196_s9 = int_to_ptr.vmem [resolvable:$true] %s1195_s9 }
  0x1d   : > { %v1566_v0 = vld [vmem:[%s1563_s20] sm:$0xff]  ;;  %v1569_v1 = vld [vmem:[%s1563_s20 + $0x8] sm:$0xff]  ;;  %v1572_v2 = vld [vmem:[%s1563_s20 + $0x18] sm:$0xff] }
  0x1e   : > { %v1575_v3 = vld [vmem:[%s1563_s20 + $0x20] sm:$0xff]  ;;  %v1578_v4 = vld [vmem:[%s1563_s20 + $0x30] sm:$0xff]  ;;  %v1581_v5 = vld [vmem:[%s1563_s20 + $0x38] sm:$0xff]  ;;  %v287_v6 = vsel %vm286_vm0, %v1566_v0, 0.0  ;;  %v288_v7 = vsel %vm286_vm0, %v1569_v1, 0.0  ;;  %v296_v8 = vsel %vm286_vm0, %v1572_v2, 0.0 }
  0x1f   : > { %v289_v9 = vadd.f32 %v288_v7, %v287_v6  ;;  %v297_v10 = vsel %vm286_vm0, %v1575_v3, 0.0  ;;  %v305_v11 = vsel %vm286_vm0, %v1578_v4, 0.0  ;;  %v306_v12 = vsel %vm286_vm0, %v1581_v5, 0.0  ;;  %v279_v25 = vld [vmem:[%s1563_s20 + $0x10] sm:$0x3] }
  0x20   : > { %v298_v13 = vadd.f32 %v297_v10, %v296_v8  ;;  %v307_v14 = vadd.f32 %v306_v12, %v305_v11  ;;  %v427_v15 = vrot.slane %v1566_v0, 1  ;;  %v428_v16 = vrot.slane %v1569_v1, 1  ;;  %v282_v30 = vld [vmem:[%s1563_s20 + $0x28] sm:$0x3]  ;;  %v285_v35 = vld [vmem:[%s1563_s20 + $0x40] sm:$0x3] }
  0x21   : > { %v290_v17 = vrot.slane %v289_v9, 4  ;;  %v432_v18 = vrot.slane %v1572_v2, 1  ;;  %v433_v19 = vrot.slane %v1575_v3, 1  ;;  %v437_v20 = vrot.slane %v1578_v4, 1 }
  0x22   : > { %v299_v21 = vrot.slane %v298_v13, 4  ;;  %v308_v22 = vrot.slane %v307_v14, 4  ;;  %v438_v23 = vrot.slane %v1581_v5, 1  ;;  %v575_v24 = vrot.slane %v1566_v0, 2 }
  0x23   : > { %v291_v26 = vadd.f32 %v290_v17, %v289_v9  ;;  %v576_v27 = vrot.slane %v1569_v1, 2  ;;  %v580_v28 = vrot.slane %v1572_v2, 2  ;;  %v581_v29 = vrot.slane %v1575_v3, 2 }
  0x24   : > { %v300_v31 = vadd.f32 %v299_v21, %v298_v13  ;;  %v309_v32 = vadd.f32 %v308_v22, %v307_v14  ;;  %v585_v33 = vrot.slane %v1578_v4, 2  ;;  %v586_v34 = vrot.slane %v1581_v5, 2 }
  0x25   : > { %v292_v36 = vrot.slane %v291_v26, 2  ;;  %v429_v37 = vsel %vm426_vm1, %v427_v15, %v428_v16  ;;  %v430_v38 = vrot.slane %v279_v25, 1  ;;  %v434_v39 = vsel %vm426_vm1, %v432_v18, %v433_v19 }
  0x26   : > { %v301_v40 = vrot.slane %v300_v31, 2  ;;  %v310_v41 = vrot.slane %v309_v32, 2  ;;  %v435_v42 = vrot.slane %v282_v30, 1  ;;  %v439_v43 = vsel %vm426_vm1, %v437_v20, %v438_v23 }
  0x27   : > { %v293_v44 = vadd.f32 %v292_v36, %v291_v26  ;;  %v431_v45 = vsel %vm426_vm1, %v428_v16, %v430_v38  ;;  %v440_v46 = vrot.slane %v285_v35, 1  ;;  %v448_v47 = vsel %vm286_vm0, %v429_v37, 0.0 }
  0x28   : > { %v302_v48 = vadd.f32 %v301_v40, %v300_v31  ;;  %v311_v49 = vadd.f32 %v310_v41, %v309_v32  ;;  %v436_v50 = vsel %vm426_vm1, %v433_v19, %v435_v42  ;;  %v449_v51 = vsel %vm286_vm0, %v431_v45, 0.0 }
  0x29   : > { %v294_v52 = vrot.slane %v293_v44, 1  ;;  %v441_v53 = vsel %vm426_vm1, %v438_v23, %v440_v46  ;;  %v450_v54 = vadd.f32 %v449_v51, %v448_v47  ;;  %v457_v55 = vsel %vm286_vm0, %v434_v39, 0.0 }
  0x2a   : > { %v303_v56 = vrot.slane %v302_v48, 1  ;;  %v312_v57 = vrot.slane %v311_v49, 1  ;;  %v458_v58 = vsel %vm286_vm0, %v436_v50, 0.0  ;;  %v466_v59 = vsel %vm286_vm0, %v439_v43, 0.0 }
  0x2b   : > { %v295_v60 = vadd.f32 %v294_v52, %v293_v44  ;;  %v451_v61 = vrot.slane %v450_v54, 4  ;;  %v459_v62 = vadd.f32 %v458_v58, %v457_v55  ;;  %v467_v63 = vsel %vm286_vm0, %v441_v53, 0.0 }
  0x2c   : > { %v304_v0 = vadd.f32 %v303_v56, %v302_v48  ;;  %v313_v1 = vadd.f32 %v312_v57, %v311_v49  ;;  %v468_v2 = vadd.f32 %v467_v63, %v466_v59  ;;  %v577_v5 = vsel %vm574_vm4, %v575_v24, %v576_v27 }
  0x2d   : > { %v452_v3 = vadd.f32 %v451_v61, %v450_v54  ;;  %v460_v4 = vrot.slane %v459_v62, 4  ;;  %v578_v6 = vrot.slane %v279_v25, 2  ;;  %v582_v9 = vsel %vm574_vm4, %v580_v28, %v581_v29 }
  0x2e   : > { %v318_v7 = vsel %vm317_vm2, %v304_v0, %v295_v60  ;;  %v469_v8 = vrot.slane %v468_v2, 4  ;;  %v583_v10 = vrot.slane %v282_v30, 2  ;;  %v587_v17 = vsel %vm574_vm4, %v585_v33, %v586_v34  ;;  %v1648_v0 = vld [vmem:[%s2059_s3 + $0x78] sm:$0xff] }
  0x2f   : > { %v320_v11 = vsel %vm319_vm3, %v313_v1, %v318_v7  ;;  %v453_v12 = vrot.slane %v452_v3, 2  ;;  %v461_v13 = vadd.f32 %v460_v4, %v459_v62  ;;  %v579_v14 = vsel %vm574_vm4, %v576_v27, %v578_v6  ;;  %v1653_v1 = vld [vmem:[%s2059_s3 + $0x70] sm:$0xff]  ;;  %763 = vmatpush.msra.mxu0 %v1648_v0  ;;  %837 = vmatpush.msra.mxu2 %v1648_v0  ;;  %v1668_v6 = vld [vmem:[%s2059_s3 + $0x60] sm:$0xff]  ;;  %v1674_v7 = vld [vmem:[%s2059_s3 + $0x58] sm:$0xff] }
  0x30   : > { %353 = vrot.lane.b32.xlu0 %v320_v11, %s1460_s26  ;;  %v470_v15 = vadd.f32 %v469_v8, %v468_v2  ;;  %v584_v16 = vsel %vm574_vm4, %v581_v29, %v583_v10  ;;  %v588_v18 = vrot.slane %v285_v35, 2  ;;  %v596_v21 = vsel %vm286_vm0, %v577_v5, 0.0  ;;  %v326_v2 = vld [vmem:[#allocation2] sm:$0x77]  ;;  %v360_v8 = vld [vmem:[#allocation2 + $0x8] sm:$0x77] }
  0x31   : > { %v454_v19 = vadd.f32 %v453_v12, %v452_v3  ;;  %v462_v20 = vrot.slane %v461_v13, 2  ;;  %v597_v22 = vsel %vm286_vm0, %v579_v14, 0.0  ;;  %v605_v26 = vsel %vm286_vm0, %v582_v9, 0.0  ;;  %v1660_v3 = vld [vmem:[%s2059_s3 + $0x68] sm:$0xff]  ;;  %328 = vst [vmem:[#allocation1] ss:$2 sm:$0xff] %v326_v2  ;;  %764 = vmatpush.msra.mxu0 %v1653_v1  ;;  %838 = vmatpush.msra.mxu2 %v1653_v1 }
  0x32   : > { %v471_v23 = vrot.slane %v470_v15, 2  ;;  %v589_v24 = vsel %vm574_vm4, %v586_v34, %v588_v18  ;;  %v598_v25 = vadd.f32 %v597_v22, %v596_v21  ;;  %v606_v30 = vsel %vm286_vm0, %v584_v16, 0.0 }
  0x33   : > { %v455_v27 = vrot.slane %v454_v19, 1  ;;  %v463_v28 = vadd.f32 %v462_v20, %v461_v13  ;;  %v614_v29 = vsel %vm286_vm0, %v587_v17, 0.0  ;;  %v607_v33 = vadd.f32 %v606_v30, %v605_v26  ;;  %765 = vmatpush.msra.mxu0 %v1660_v3  ;;  %839 = vmatpush.msra.mxu2 %v1660_v3  ;;  %v1707_v30 = vld [vmem:[%s2059_s3 + $0x48] sm:$0xff] }
  0x34   : > { %v472_v31 = vadd.f32 %v471_v23, %v470_v15  ;;  %v599_v32 = vrot.slane %v598_v25, 4  ;;  %v615_v35 = vsel %vm286_vm0, %v589_v24, 0.0  ;;  %v323_v62 = vsel %vm322_vm5, %v320_v11, 0.0  ;;  %v392_v15 = vld [vmem:[#allocation2 + $0x10] sm:$0x77] }
  0x35   : > { %v456_v36 = vadd.f32 %v455_v27, %v454_v19  ;;  %v464_v37 = vrot.slane %v463_v28, 1  ;;  %v616_v38 = vadd.f32 %v615_v35, %v614_v29  ;;  %v608_v34 = vrot.slane %v607_v33, 4  ;;  %766 = vmatpush.msra.mxu0 %v1668_v6  ;;  %840 = vmatpush.msra.mxu2 %v1668_v6  ;;  %v485_v23 = vld [vmem:[#allocation2 + $0x18] sm:$0x77]  ;;  %v1712_v29 = vld [vmem:[%s2059_s3 + $0xb8] sm:$0xff] }
  0x36   : > { %v473_v39 = vrot.slane %v472_v31, 1  ;;  %v600_v40 = vadd.f32 %v599_v32, %v598_v25  ;;  %791 = vmatpush.msra.mxu1 %v1712_v29  ;;  %v1724_v32 = vld [vmem:[%s2059_s3 + $0x40] sm:$0xff]  ;;  %865 = vmatpush.msra.mxu3 %v1712_v29 }
  0x37   : > { %v465_v41 = vadd.f32 %v464_v37, %v463_v28  ;;  %v617_v42 = vrot.slane %v616_v38, 4  ;;  %v609_v45 = vadd.f32 %v608_v34, %v607_v33  ;;  %767 = vmatpush.msra.mxu0 %v1674_v7  ;;  %841 = vmatpush.msra.mxu2 %v1674_v7  ;;  %v1702_v28 = vld [vmem:[%s2059_s3 + $0x50] sm:$0xff] }
  0x38   : > { %v474_v43 = vadd.f32 %v473_v39, %v472_v31  ;;  %385 = vrot.lane.b32.xlu0 %v320_v11, %s1461_s28  ;;  %v601_v44 = vrot.slane %v600_v40, 2  ;;  %v1680_v9 = vld.sshfl [vmem:[#allocation1] sm:$0xff pattern:$0x75316420]  ;;  %v1719_v31 = vld [vmem:[%s2059_s3 + $0xb0] sm:$0xff] }
  0x39   : > { %v478_v46 = vsel %vm317_vm2, %v465_v41, %v456_v36  ;;  %v618_v47 = vadd.f32 %v617_v42, %v616_v38  ;;  %v610_v50 = vrot.slane %v609_v45, 2  ;;  %v1682_v10 = vld.sshfl [vmem:[#allocation1 + $0x8] sm:$0xff pattern:$0x75316420]  ;;  %768 = vmatpush.msra.mxu0 %v1702_v28  ;;  %842 = vmatpush.msra.mxu2 %v1702_v28  ;;  %v549_v39 = vld [vmem:[#allocation2 + $0x28] sm:$0x77] }
  0x3a   : > { %v479_v48 = vsel %vm319_vm3, %v474_v43, %v478_v46  ;;  %v602_v49 = vadd.f32 %v601_v44, %v600_v40  ;;  %362 = vst [vmem:[#allocation1] ss:$2 sm:$0xff] %v360_v8  ;;  %792 = vmatpush.msra.mxu1 %v1719_v31  ;;  %866 = vmatpush.msra.mxu3 %v1719_v31  ;;  %v517_v36 = vld [vmem:[#allocation2 + $0x20] sm:$0x77]  ;;  %v633_v40 = vld [vmem:[#allocation2 + $0x30] sm:$0x77] }
  0x3b   : > { %510 = vrot.lane.b32.xlu1 %v479_v48, %s1460_s26  ;;  %v619_v51 = vrot.slane %v618_v47, 2  ;;  %v611_v53 = vadd.f32 %v610_v50, %v609_v45  ;;  %v481_v63 = vsel %vm322_vm5, %v479_v48, 0.0  ;;  %769 = vmatpush.msra.mxu0 %v1707_v30  ;;  %v1745_v42 = vld [vmem:[%s2059_s3 + $0x38] sm:$0xff]  ;;  %v1750_v43 = vld [vmem:[%s2059_s3 + $0xa8] sm:$0xff]  ;;  %v1757_v44 = vld [vmem:[%s2059_s3 + $0x30] sm:$0xff] }
  0x3c   : > { %v603_v52 = vrot.slane %v602_v49, 1  ;;  %843 = vmatpush.msra.mxu2 %v1707_v30  ;;  %793 = vmatpush.msra.mxu1 %v1750_v43  ;;  %v1762_v45 = vld [vmem:[%s2059_s3 + $0xa0] sm:$0xff]  ;;  %v1771_v46 = vld [vmem:[%s2059_s3 + $0x28] sm:$0xff] }
  0x3d   : > { %v620_v54 = vadd.f32 %v619_v51, %v618_v47  ;;  %v612_v56 = vrot.slane %v611_v53, 1  ;;  %770 = vmatpush.msra.mxu0 %v1724_v32  ;;  %867 = vmatpush.msra.mxu3 %v1750_v43  ;;  %v1776_v47 = vld [vmem:[%s2059_s3 + $0x98] sm:$0xff]  ;;  %v665_v50 = vld [vmem:[#allocation2 + $0x38] sm:$0x77] }
  0x3e   : > { %v604_v55 = vadd.f32 %v603_v52, %v602_v49  ;;  %844 = vmatpush.msra.mxu2 %v1724_v32  ;;  %794 = vmatpush.msra.mxu1 %v1762_v45  ;;  %v1789_v51 = vld [vmem:[%s2059_s3 + $0x20] sm:$0xff]  ;;  %v1794_v52 = vld [vmem:[%s2059_s3 + $0x90] sm:$0xff] }
  0x3f   : > { %v621_v57 = vrot.slane %v620_v54, 1  ;;  %v613_v58 = vadd.f32 %v612_v56, %v611_v53  ;;  %771 = vmatpush.msra.mxu0 %v1745_v42  ;;  %868 = vmatpush.msra.mxu3 %v1762_v45 }
  0x40   : > { %845 = vmatpush.msra.mxu2 %v1745_v42  ;;  %795 = vmatpush.msra.mxu1 %v1776_v47 }
  0x41   : > { %v622_v59 = vadd.f32 %v621_v57, %v620_v54  ;;  %v626_v60 = vsel %vm317_vm2, %v613_v58, %v604_v55  ;;  %v1687_v17 = vld.sshfl [vmem:[#allocation1] sm:$0xff pattern:$0x75316420]  ;;  %v1689_v18 = vld.sshfl [vmem:[#allocation1 + $0x8] sm:$0xff pattern:$0x75316420]  ;;  %772 = vmatpush.msra.mxu0 %v1757_v44  ;;  %869 = vmatpush.msra.mxu3 %v1776_v47 }
  0x42   : > { %394 = vst [vmem:[#allocation1] ss:$2 sm:$0xff] %v392_v15  ;;  %846 = vmatpush.msra.mxu2 %v1757_v44  ;;  %796 = vmatpush.msra.mxu1 %v1794_v52  ;;  %v1803_v54 = vld [vmem:[%s2059_s3 + $0x18] sm:$0xff]  ;;  %v1808_v55 = vld [vmem:[%s2059_s3 + $0x88] sm:$0xff] }
  0x43   : > { %542 = vrot.lane.b32.xlu1 %v479_v48, %s1461_s28  ;;  %v627_v61 = vsel %vm319_vm3, %v622_v59, %v626_v60  ;;  %773 = vmatpush.msra.mxu0 %v1771_v46  ;;  %v1819_v59 = vld [vmem:[%s2059_s3 + $0x10] sm:$0xff]  ;;  %v1824_v60 = vld [vmem:[%s2059_s3 + $0x80] sm:$0xff] }
  0x44   : > { %658 = vrot.lane.b32.xlu2 %v627_v61, %s1460_s26  ;;  %v629_v19 = vsel %vm322_vm5, %v627_v61, 0.0  ;;  %847 = vmatpush.msra.mxu2 %v1771_v46  ;;  %s1193_s26 = scalar_lea.hbm %s2062_s6, %s1518_s25 }
  0x45   : > { %774 = vmatpush.msra.mxu0 %v1789_v51  ;;  %870 = vmatpush.msra.mxu3 %v1794_v52  ;;  %s1197_s16 = sshll.u32 %s1193_s26, 4  ;;  %s1198_s16 = int_to_ptr.hbm [resolvable:$true] %s1197_s16 }
  0x46   : > { %848 = vmatpush.msra.mxu2 %v1789_v51  ;;  %797 = vmatpush.msra.mxu1 %v1808_v55  ;;  %s1403_s11 = sshra.s32 %s1198_s16, 4  ;;  %s1404_s11 = int_to_ptr.hbm [resolvable:$true] %s1403_s11 }
  0x47   : > { %775 = vmatpush.msra.mxu0 %v1803_v54  ;;  %871 = vmatpush.msra.mxu3 %v1808_v55  ;;  %s1405_s12 = scalar_lea.hbm %s1404_s11, 1  ;;  %p1410_p3 = scmp.lt.s32.totalorder %s1404_s11, %s2062_s6 }
  0x48   : > { %849 = vmatpush.msra.mxu2 %v1803_v54  ;;  %798 = vmatpush.msra.mxu1 %v1824_v60  ;;  %p1406_p0 = scmp.ne.s32.totalorder %s1404_s11, %s1405_s12 }
  0x49   : > { %v1694_v24 = vld.sshfl [vmem:[#allocation1] sm:$0xff pattern:$0x75316420]  ;;  %v1696_v25 = vld.sshfl [vmem:[#allocation1 + $0x8] sm:$0xff pattern:$0x75316420]  ;;  %776 = vmatpush.msra.mxu0 %v1819_v59  ;;  %872 = vmatpush.msra.mxu3 %v1824_v60 }
  0x4a   : > { %487 = vst [vmem:[#allocation1] ss:$2 sm:$0xff] %v485_v23  ;;  %911 = vmatpush.msrb.mxu1 %v1648_v0  ;;  %850 = vmatpush.msra.mxu2 %v1819_v59  ;;  %p1407_p1 = pnand %p1406_p0, %p1535_p5 }
  0x4b   : > { %939 = vmatpush.msrb.mxu3 %v1712_v29 }
  0x4c   : > { %690 = vrot.lane.b32.xlu2 %v627_v61, %s1461_s28  ;;  %912 = vmatpush.msrb.mxu1 %v1653_v1  ;;  %s2001_s28 = scalar_lea.vmem %s2061_s5, %s1295_s19  ;;  %p1408_p2 = pneg %p1407_p1 }
  0x4d   : > { %940 = vmatpush.msrb.mxu3 %v1719_v31 }
  0x4e   : > { %913 = vmatpush.msrb.mxu1 %v1660_v3 }
  0x4f   : > { %941 = vmatpush.msrb.mxu3 %v1750_v43 }
  0x50   : > { %914 = vmatpush.msrb.mxu1 %v1668_v6 }
  0x51   : > { %v488_v33 = vld.sshfl [vmem:[#allocation1] sm:$0xff pattern:$0x75316420]  ;;  %v489_v35 = vld.sshfl [vmem:[#allocation1 + $0x8] sm:$0xff pattern:$0x75316420]  ;;  %942 = vmatpush.msrb.mxu3 %v1762_v45 }
  0x52   : > { %519 = vst [vmem:[#allocation1] ss:$2 sm:$0xff] %v517_v36  ;;  %915 = vmatpush.msrb.mxu1 %v1674_v7 }
  0x53   : > { %943 = vmatpush.msrb.mxu3 %v1776_v47 }
  0x54   : > { %916 = vmatpush.msrb.mxu1 %v1702_v28 }
  0x55   : > { %944 = vmatpush.msrb.mxu3 %v1794_v52 }
  0x56   : > { %917 = vmatpush.msrb.mxu1 %v1707_v30 }
  0x57   : > { %945 = vmatpush.msrb.mxu3 %v1808_v55 }
  0x58   : > { %918 = vmatpush.msrb.mxu1 %v1724_v32 }
  0x59   : > { %v1734_v37 = vld.sshfl [vmem:[#allocation1] sm:$0xff pattern:$0x75316420]  ;;  %v1736_v38 = vld.sshfl [vmem:[#allocation1 + $0x8] sm:$0xff pattern:$0x75316420]  ;;  %946 = vmatpush.msrb.mxu3 %v1824_v60 }
  0x5a   : > { %551 = vst [vmem:[#allocation1] ss:$2 sm:$0xff] %v549_v39  ;;  %919 = vmatpush.msrb.mxu1 %v1745_v42 }
  0x5c   : > { %920 = vmatpush.msrb.mxu1 %v1757_v44 }
  0x5e   : > { %921 = vmatpush.msrb.mxu1 %v1771_v46 }
  0x60   : > { %922 = vmatpush.msrb.mxu1 %v1789_v51 }
  0x61   : > { %v1738_v34 = vld.sshfl [vmem:[#allocation1] sm:$0xff pattern:$0x75316420]  ;;  %v1740_v41 = vld.sshfl [vmem:[#allocation1 + $0x8] sm:$0xff pattern:$0x75316420] }
  0x62   : > { %324 = vadd.xlane.f32.xlu0 %v323_v62  ;;  %635 = vst [vmem:[#allocation1] ss:$2 sm:$0xff] %v633_v40  ;;  %923 = vmatpush.msrb.mxu1 %v1803_v54 }
  0x64   : > { %924 = vmatpush.msrb.mxu1 %v1819_v59 }
  0x69   : > { %v1778_v48 = vld.sshfl [vmem:[#allocation1] sm:$0xff pattern:$0x75316420]  ;;  %v1784_v49 = vld.sshfl [vmem:[#allocation1 + $0x8] sm:$0xff pattern:$0x75316420] }
  0x6a   : > { %667 = vst [vmem:[#allocation1] ss:$2 sm:$0xff] %v665_v50 }
  0x71   : > { %v1832_v2 = vld.sshfl [vmem:[#allocation1] sm:$0xff pattern:$0x75316420] }
  0x75   : > { %482 = vadd.xlane.f32.xlu2 %v481_v63  ;;  %v697_v63 = vld [vmem:[#allocation2 + $0x40] sm:$0x77] }
  0x9e   : > { %v659_v16 = vpop.permute.xlu2 %658 }
  0x9f   : > { %v661_v20 = vsel %vm322_vm5, %v659_v16, 0.0 }
  0xa2   : > { %v354_v4 = vpop.permute.xlu0 %353 }
  0xa3   : > { %v356_v5 = vsel %vm322_vm5, %v354_v4, 0.0  ;;  %v1834_v4 = vld.sshfl [vmem:[#allocation1 + $0x8] sm:$0xff pattern:$0x75316420] }
  0xa4   : > { %357 = vadd.xlane.f32.xlu1 %v356_v5  ;;  %699 = vst [vmem:[#allocation1] ss:$2 sm:$0xff] %v697_v63 }
  0xa6   : > { %v691_v26 = vpop.permute.xlu2 %690 }
  0xa7   : > { %v693_v27 = vsel %vm322_vm5, %v691_v26, 0.0 }
  0xaa   : > { %v386_v11 = vpop.permute.xlu0 %385 }
  0xab   : > { %v388_v12 = vsel %vm322_vm5, %v386_v11, 0.0 }
  0xac   : > { %389 = vadd.xlane.f32.xlu2 %v388_v12 }
  0xad   : > { %v511_v13 = vpop.permute.xlu1 %510 }
  0xae   : > { %v513_v14 = vsel %vm322_vm5, %v511_v13, 0.0 }
  0xaf   : > { %514 = vadd.xlane.f32.xlu0 %v513_v14 }
  0xb4   : > { %630 = vadd.xlane.f32.xlu2 %v629_v19 }
  0xb5   : > { %v543_v21 = vpop.permute.xlu1 %542 }
  0xb6   : > { %v545_v22 = vsel %vm322_vm5, %v543_v21, 0.0 }
  0xb7   : > { %546 = vadd.xlane.f32.xlu1 %v545_v22  ;;  %662 = vadd.xlane.f32.xlu0 %v661_v20 }
  0xbf   : > { %694 = vadd.xlane.f32.xlu1 %v693_v27 }
  0xd5   : > { %v325_v53 = vpop.xlane.xlu0 %324 }
  0xd6   : > { %v333_v57 = vmul.f32 %v1680_v9, %v325_v53  ;;  %v334_v58 = vmul.f32 %v1682_v10, %v325_v53  ;;  %v1842_v9 = vld [vmem:[%s2059_s3 + $0x8] sm:$0xff]  ;;  %v1850_v10 = vld [vmem:[%s2059_s3] sm:$0xff] }
  0xd7   : > { %777 = vmatpush.msra.mxu0 %v1842_v9  ;;  %851 = vmatpush.msra.mxu2 %v1842_v9 }
  0xd8   : > { %v336_v5 = vsel %vm335_vm6, %v333_v57, 0.0  ;;  %v344_v8 = vsel %vm343_vm7, %v334_v58, 0.0  ;;  %925 = vmatpush.msrb.mxu1 %v1842_v9 }
  0xd9   : > { %v337_v13 = vrot.slane %v336_v5, 4  ;;  %v345_v14 = vrot.slane %v344_v8, 4  ;;  %778 = vmatpush.msra.mxu0 %v1850_v10  ;;  %852 = vmatpush.msra.mxu2 %v1850_v10 }
  0xda   : > { %926 = vmatpush.msrb.mxu1 %v1850_v10 }
  0xdb   : > { %985 = vmatpush.msrb.mxu0 %v1648_v0  ;;  %1013 = vmatpush.msrb.mxu2 %v1712_v29  ;;  %v338_v19 = vadd.f32 %v337_v13, %v336_v5  ;;  %v346_v20 = vadd.f32 %v345_v14, %v344_v8 }
  0xdd   : > { %986 = vmatpush.msrb.mxu0 %v1653_v1  ;;  %1014 = vmatpush.msrb.mxu2 %v1719_v31  ;;  %v339_v26 = vrot.slane %v338_v19, 2  ;;  %v347_v27 = vrot.slane %v346_v20, 2 }
  0xdf   : > { %987 = vmatpush.msrb.mxu0 %v1660_v3  ;;  %1015 = vmatpush.msrb.mxu2 %v1750_v43  ;;  %v340_v53 = vadd.f32 %v339_v26, %v338_v19 }
  0xe1   : > { %988 = vmatpush.msrb.mxu0 %v1668_v6  ;;  %1016 = vmatpush.msrb.mxu2 %v1762_v45 }
  0xe3   : > { %989 = vmatpush.msrb.mxu0 %v1674_v7  ;;  %1017 = vmatpush.msrb.mxu2 %v1776_v47 }
  0xe5   : > { %990 = vmatpush.msrb.mxu0 %v1702_v28  ;;  %1018 = vmatpush.msrb.mxu2 %v1794_v52 }
  0xe7   : > { %991 = vmatpush.msrb.mxu0 %v1707_v30  ;;  %1019 = vmatpush.msrb.mxu2 %v1808_v55 }
  0xe8   : > { %v483_v56 = vpop.xlane.xlu2 %482 }
  0xe9   : > { %v492_v61 = vmul.f32 %v488_v33, %v483_v56  ;;  %v493_v62 = vmul.f32 %v489_v35, %v483_v56  ;;  %v348_v56 = vadd.f32 %v347_v27, %v346_v20  ;;  %992 = vmatpush.msrb.mxu0 %v1724_v32  ;;  %1020 = vmatpush.msrb.mxu2 %v1824_v60 }
  0xeb   : > { %v494_v11 = vsel %vm335_vm6, %v492_v61, 0.0  ;;  %v501_v12 = vsel %vm343_vm7, %v493_v62, 0.0  ;;  %993 = vmatpush.msrb.mxu0 %v1745_v42 }
  0xec   : > { %v495_v15 = vrot.slane %v494_v11, 4  ;;  %v502_v16 = vrot.slane %v501_v12, 4 }
  0xed   : > { %994 = vmatpush.msrb.mxu0 %v1757_v44 }
  0xee   : > { %v496_v21 = vadd.f32 %v495_v15, %v494_v11  ;;  %v503_v22 = vadd.f32 %v502_v16, %v501_v12  ;;  %v341_v11 = vrot.slane %v340_v53, 1  ;;  %v349_v12 = vrot.slane %v348_v56, 1 }
  0xef   : > { %995 = vmatpush.msrb.mxu0 %v1771_v46 }
  0xf0   : > { %v497_v36 = vrot.slane %v496_v21, 2  ;;  %v504_v39 = vrot.slane %v503_v22, 2 }
  0xf1   : > { %996 = vmatpush.msrb.mxu0 %v1789_v51 }
  0xf2   : > { %v498_v61 = vadd.f32 %v497_v36, %v496_v21  ;;  %v505_v62 = vadd.f32 %v504_v39, %v503_v22 }
  0xf3   : > { %997 = vmatpush.msrb.mxu0 %v1803_v54 }
  0xf4   : > { %v499_v19 = vrot.slane %v498_v61, 1  ;;  %v506_v20 = vrot.slane %v505_v62, 1 }
  0xf5   : > { %998 = vmatpush.msrb.mxu0 %v1819_v59 }
  0xf7   : > { %999 = vmatpush.msrb.mxu0 %v1842_v9 }
  0xf9   : > { %1000 = vmatpush.msrb.mxu0 %v1850_v10 }
 0x117   : > { %v358_v23 = vpop.xlane.xlu1 %357 }
 0x118   : > { %v367_v33 = vmul.f32 %v1687_v17, %v358_v23  ;;  %v368_v35 = vmul.f32 %v1689_v18, %v358_v23 }
 0x11a   : > { %v369_v40 = vsel %vm335_vm6, %v367_v33, 0.0  ;;  %v376_v50 = vsel %vm343_vm7, %v368_v35, 0.0  ;;  %v342_v33 = vadd.f32 %v341_v11, %v340_v53  ;;  %v350_v35 = vadd.f32 %v349_v12, %v348_v56 }
 0x11b   : > { %v370_v17 = vrot.slane %v369_v40, 4  ;;  %v377_v18 = vrot.slane %v376_v50, 4 }
 0x11d   : > { %v371_v57 = vadd.f32 %v370_v17, %v369_v40  ;;  %v378_v58 = vadd.f32 %v377_v18, %v376_v50 }
 0x11f   : > { %v372_v63 = vrot.slane %v371_v57, 2  ;;  %v379_v5 = vrot.slane %v378_v58, 2  ;;  %v390_v8 = vpop.xlane.xlu2 %389 }
 0x120   : > { %v399_v13 = vmul.f32 %v1694_v24, %v390_v8  ;;  %v400_v14 = vmul.f32 %v1696_v25, %v390_v8 }
 0x121   : > { %v373_v15 = vadd.f32 %v372_v63, %v371_v57  ;;  %v380_v16 = vadd.f32 %v379_v5, %v378_v58  ;;  %v500_v63 = vadd.f32 %v499_v19, %v498_v61  ;;  %v507_v5 = vadd.f32 %v506_v20, %v505_v62 }
 0x122   : > { %v515_v21 = vpop.xlane.xlu0 %514  ;;  %v401_v22 = vsel %vm335_vm6, %v399_v13, 0.0  ;;  %v408_v23 = vsel %vm343_vm7, %v400_v14, 0.0 }
 0x123   : > { %v374_v26 = vrot.slane %v373_v15, 1  ;;  %v381_v27 = vrot.slane %v380_v16, 1  ;;  %v524_v24 = vmul.f32 %v1734_v37, %v515_v21  ;;  %v525_v25 = vmul.f32 %v1736_v38, %v515_v21 }
 0x124   : > { %v402_v36 = vrot.slane %v401_v22, 4  ;;  %v409_v39 = vrot.slane %v408_v23, 4 }
 0x125   : > { %v375_v40 = vadd.f32 %v374_v26, %v373_v15  ;;  %v382_v50 = vadd.f32 %v381_v27, %v380_v16  ;;  %v526_v17 = vsel %vm335_vm6, %v524_v24, 0.0  ;;  %v533_v18 = vsel %vm343_vm7, %v525_v25, 0.0 }
 0x126   : > { %v527_v37 = vrot.slane %v526_v17, 4  ;;  %v534_v38 = vrot.slane %v533_v18, 4  ;;  %v403_v57 = vadd.f32 %v402_v36, %v401_v22  ;;  %v410_v58 = vadd.f32 %v409_v39, %v408_v23 }
 0x127   : > { %v383_v53 = vadd.f32 %v375_v40, %v342_v33  ;;  %v631_v56 = vpop.xlane.xlu2 %630  ;;  %v384_v14 = vadd.f32 %v382_v50, %v350_v35 }
 0x128   : > { %v528_v8 = vadd.f32 %v527_v37, %v526_v17  ;;  %v535_v11 = vadd.f32 %v534_v38, %v533_v18  ;;  %v404_v12 = vrot.slane %v403_v57, 2  ;;  %v411_v13 = vrot.slane %v410_v58, 2 }
 0x129   : > { %v640_v15 = vmul.f32 %v1778_v48, %v631_v56  ;;  %v641_v16 = vmul.f32 %v1784_v49, %v631_v56 }
 0x12a   : > { %v529_v61 = vrot.slane %v528_v8, 2  ;;  %v536_v62 = vrot.slane %v535_v11, 2  ;;  %v405_v19 = vadd.f32 %v404_v12, %v403_v57  ;;  %v412_v20 = vadd.f32 %v411_v13, %v410_v58  ;;  %v547_v21 = vpop.xlane.xlu1 %546  ;;  %v663_v22 = vpop.xlane.xlu0 %662 }
 0x12b   : > { %v556_v23 = vmul.f32 %v1738_v34, %v547_v21  ;;  %v557_v26 = vmul.f32 %v1740_v41, %v547_v21  ;;  %v672_v27 = vmul.f32 %v1832_v2, %v663_v22  ;;  %v673_v48 = vmul.f32 %v1834_v4, %v663_v22  ;;  %v701_v22 = vld.sshfl [vmem:[#allocation1 + $0x8] sm:$0xff pattern:$0x75316420] }
 0x12c   : > { %v530_v49 = vadd.f32 %v529_v61, %v528_v8  ;;  %v537_v24 = vadd.f32 %v536_v62, %v535_v11  ;;  %v406_v25 = vrot.slane %v405_v19, 1  ;;  %v413_v33 = vrot.slane %v412_v20, 1  ;;  %v700_v61 = vld.sshfl [vmem:[#allocation1] sm:$0xff pattern:$0x75316420] }
 0x12d   : > { %v558_v35 = vsel %vm335_vm6, %v556_v23, 0.0  ;;  %v565_v36 = vsel %vm343_vm7, %v557_v26, 0.0  ;;  %v674_v39 = vsel %vm335_vm6, %v672_v27, 0.0  ;;  %v681_v34 = vsel %vm343_vm7, %v673_v48, 0.0 }
 0x12e   : > { %v531_v41 = vrot.slane %v530_v49, 1  ;;  %v538_v2 = vrot.slane %v537_v24, 1  ;;  %v407_v40 = vadd.f32 %v406_v25, %v405_v19  ;;  %v414_v4 = vadd.f32 %v413_v33, %v412_v20 }
 0x12f   : > { %v559_v50 = vrot.slane %v558_v35, 4  ;;  %v566_v17 = vrot.slane %v565_v36, 4  ;;  %v675_v18 = vrot.slane %v674_v39, 4  ;;  %v682_v37 = vrot.slane %v681_v34, 4 }
 0x130   : > { %v532_v38 = vadd.f32 %v531_v41, %v530_v49  ;;  %v539_v57 = vadd.f32 %v538_v2, %v537_v24  ;;  %v415_v58 = vadd.f32 %v407_v40, %v383_v53  ;;  %v416_v56 = vadd.f32 %v414_v4, %v384_v14 }
 0x131   : > { %v560_v8 = vadd.f32 %v559_v50, %v558_v35  ;;  %v567_v11 = vadd.f32 %v566_v17, %v565_v36  ;;  %v676_v12 = vadd.f32 %v675_v18, %v674_v39  ;;  %v683_v13 = vadd.f32 %v682_v37, %v681_v34 }
 0x132   : > { %v508_v62 = vadd.f32 %v500_v63, %v415_v58  ;;  %v509_v21 = vadd.f32 %v507_v5, %v416_v56  ;;  %v642_v19 = vsel %vm335_vm6, %v640_v15, 0.0  ;;  %v649_v20 = vsel %vm343_vm7, %v641_v16, 0.0  ;;  %v695_v49 = vpop.xlane.xlu1 %694 }
 0x133   : > { %v561_v23 = vrot.slane %v560_v8, 2  ;;  %v568_v26 = vrot.slane %v567_v11, 2  ;;  %v677_v27 = vrot.slane %v676_v12, 2  ;;  %v684_v48 = vrot.slane %v683_v13, 2 }
 0x134   : > { %v643_v24 = vrot.slane %v642_v19, 4  ;;  %v650_v53 = vrot.slane %v649_v20, 4  ;;  %v540_v14 = vadd.f32 %v532_v38, %v508_v62  ;;  %v541_v25 = vadd.f32 %v539_v57, %v509_v21 }
 0x135   : > { %v562_v33 = vadd.f32 %v561_v23, %v560_v8  ;;  %v569_v35 = vadd.f32 %v568_v26, %v567_v11  ;;  %v704_v63 = vmul.f32 %v700_v61, %v695_v49  ;;  %v705_v5 = vmul.f32 %v701_v22, %v695_v49 }
 0x136   : > { %v644_v36 = vadd.f32 %v643_v24, %v642_v19  ;;  %v651_v39 = vadd.f32 %v650_v53, %v649_v20  ;;  %v678_v41 = vadd.f32 %v677_v27, %v676_v12  ;;  %v685_v16 = vadd.f32 %v684_v48, %v683_v13 }
 0x137   : > { %v563_v34 = vrot.slane %v562_v33, 1  ;;  %v570_v15 = vrot.slane %v569_v35, 1  ;;  %v706_v4 = vsel %vm335_vm6, %v704_v63, 0.0  ;;  %v713_v50 = vsel %vm343_vm7, %v705_v5, 0.0 }
 0x138   : > { %v645_v2 = vrot.slane %v644_v36, 2  ;;  %v652_v40 = vrot.slane %v651_v39, 2  ;;  %v707_v57 = vrot.slane %v706_v4, 4  ;;  %v714_v58 = vrot.slane %v713_v50, 4 }
 0x139   : > { %v564_v17 = vadd.f32 %v563_v34, %v562_v33  ;;  %v571_v18 = vadd.f32 %v570_v15, %v569_v35  ;;  %v679_v11 = vrot.slane %v678_v41, 1  ;;  %v686_v61 = vrot.slane %v685_v16, 1 }
 0x13a   : > { %v646_v37 = vadd.f32 %v645_v2, %v644_v36  ;;  %v653_v38 = vadd.f32 %v652_v40, %v651_v39  ;;  %v708_v12 = vadd.f32 %v707_v57, %v706_v4  ;;  %v715_v13 = vadd.f32 %v714_v58, %v713_v50  ;;  %v724_v36 = vld [vmem:[%s2058_s2] sm:$0x3] }
 0x13b   : > { %v572_v56 = vadd.f32 %v564_v17, %v540_v14  ;;  %v573_v8 = vadd.f32 %v571_v18, %v541_v25  ;;  %v680_v26 = vadd.f32 %v679_v11, %v678_v41  ;;  %v687_v27 = vadd.f32 %v686_v61, %v685_v16 }
 0x13c   : > { %v647_v62 = vrot.slane %v646_v37, 1  ;;  %v654_v21 = vrot.slane %v653_v38, 1  ;;  %v709_v22 = vrot.slane %v708_v12, 2  ;;  %v716_v23 = vrot.slane %v715_v13, 2 }
 0x13d   : > { %v726_v5 = vperm.slane %v724_v36, 0  ;;  %v727_v34 = vperm.slane %v724_v36, 1 }
 0x13e   : > { %v648_v19 = vadd.f32 %v647_v62, %v646_v37  ;;  %v655_v20 = vadd.f32 %v654_v21, %v653_v38  ;;  %v710_v24 = vadd.f32 %v709_v22, %v708_v12  ;;  %v717_v53 = vadd.f32 %v716_v23, %v715_v13  ;;  %v1055_v22 = vld [vmem:[%s2060_s4] sm:$0x1] }
 0x140   : > { %v656_v48 = vadd.f32 %v648_v19, %v572_v56  ;;  %v657_v49 = vadd.f32 %v655_v20, %v573_v8  ;;  %v711_v14 = vrot.slane %v710_v24, 1  ;;  %v718_v25 = vrot.slane %v717_v53, 1  ;;  %v981_v8 = vld [vmem:[%s2060_s4] sm:$0x1] }
 0x142   : > { %v688_v33 = vadd.f32 %v680_v26, %v656_v48  ;;  %v689_v35 = vadd.f32 %v687_v27, %v657_v49  ;;  %v712_v39 = vadd.f32 %v711_v14, %v710_v24  ;;  %v719_v63 = vadd.f32 %v718_v25, %v717_v53  ;;  %v1129_v26 = vld [vmem:[%s2060_s4] sm:$0x1] }
 0x144   : > { %v720_v15 = vadd.f32 %v712_v39, %v688_v33  ;;  %v721_v2 = vadd.f32 %v719_v63, %v689_v35 }
 0x146   : > { %v722_v41 = vmul.f32 0.00390625, %v720_v15  ;;  %v723_v16 = vmul.f32 0.00390625, %v721_v2 }
 0x148   : > { %v1931_v40 = vadd.f32 %v726_v5, %v722_v41  ;;  %v731_v4 = vadd.f32 %v727_v34, %v723_v16 }
 0x14a   : > { %779 = vmatmul.f32.vlgmr.msra.gmra.mxu0 %v1931_v40  ;;  %1296 = vmatmul.msk.f32.vlgmr.msra.gmra.mxu1 %vm759_vm8, %v731_v4  ;;  %v805_v50 = vmul.f32 0.2, %v1931_v40  ;;  %v806_v17 = vmul.f32 0.2, %v731_v4 }
 0x14b   : > { %1087 = vmatpush.msra.mxu1 %v1712_v29  ;;  %1161 = vmatpush.msra.mxu0 %v1712_v29 }
 0x14c   : > { %v807_v18 = vadd.f32 %v805_v50, %v1931_v40  ;;  %v808_v37 = vadd.f32 %v806_v17, %v731_v4 }
 0x14d   : > { %1088 = vmatpush.msra.mxu1 %v1719_v31  ;;  %1162 = vmatpush.msra.mxu0 %v1719_v31 }
 0x14e   : > { %853 = vmatmul.f32.vlgmr.msra.gmra.mxu2 %v807_v18  ;;  %v879_v38 = vmul.f32 0.2, %v807_v18  ;;  %1297 = vmatmul.msk.f32.vlgmr.msra.gmra.mxu3 %vm759_vm8, %v808_v37  ;;  %v880_v57 = vmul.f32 0.2, %v808_v37 }
 0x14f   : > { %1059 = vmatpush.msra.mxu3 %v1648_v0  ;;  %1133 = vmatpush.msra.mxu2 %v1648_v0 }
 0x150   : > { %1089 = vmatpush.msra.mxu1 %v1750_v43  ;;  %v881_v29 = vadd.f32 %v879_v38, %v1931_v40  ;;  %1163 = vmatpush.msra.mxu0 %v1750_v43  ;;  %v882_v58 = vadd.f32 %v880_v57, %v731_v4 }
 0x151   : > { %1060 = vmatpush.msra.mxu3 %v1653_v1  ;;  %1134 = vmatpush.msra.mxu2 %v1653_v1 }
 0x152   : > { %1090 = vmatpush.msra.mxu1 %v1762_v45  ;;  %1164 = vmatpush.msra.mxu0 %v1762_v45  ;;  %v953_v31 = vmul.f32 0.2, %v881_v29  ;;  %v954_v56 = vmul.f32 0.2, %v882_v58 }
 0x153   : > { %927 = vmatmul.f32.vlgmr.msrb.gmra.mxu1 %v881_v29  ;;  %1061 = vmatpush.msra.mxu3 %v1660_v3 }
 0x154   : > { %1135 = vmatpush.msra.mxu2 %v1660_v3  ;;  %1091 = vmatpush.msra.mxu1 %v1776_v47  ;;  %v955_v0 = vadd.f32 %v953_v31, %v1931_v40  ;;  %v956_v43 = vadd.f32 %v954_v56, %v731_v4 }
 0x155   : > { %1062 = vmatpush.msra.mxu3 %v1668_v6  ;;  %1165 = vmatpush.msra.mxu0 %v1776_v47 }
 0x156   : > { %1136 = vmatpush.msra.mxu2 %v1668_v6  ;;  %1092 = vmatpush.msra.mxu1 %v1794_v52  ;;  %v1028_v1 = vmul.f32 0.2, %v956_v43 }
 0x157   : > { %1298 = vmatmul.msk.f32.vlgmr.msrb.gmra.mxu3 %vm759_vm8, %v882_v58  ;;  %1001 = vmatmul.f32.vlgmr.msrb.gmra.mxu0 %v955_v0 }
 0x158   : > { %1299 = vmatmul.msk.f32.vlgmr.msrb.gmra.mxu2 %vm759_vm8, %v956_v43  ;;  %v1030_v3 = vadd.f32 %v1028_v1, %v731_v4  ;;  %1063 = vmatpush.msra.mxu3 %v1674_v7 }
 0x159   : > { %1137 = vmatpush.msra.mxu2 %v1674_v7  ;;  %1093 = vmatpush.msra.mxu1 %v1808_v55  ;;  %v1027_v7 = vmul.f32 0.2, %v955_v0 }
 0x15a   : > { %v1102_v45 = vmul.f32 0.2, %v1030_v3  ;;  %1064 = vmatpush.msra.mxu3 %v1702_v28  ;;  %1166 = vmatpush.msra.mxu0 %v1794_v52  ;;  %v833_v52 = vld [vmem:[%s2060_s4] sm:$0x1] }
 0x15b   : > { %1138 = vmatpush.msra.mxu2 %v1702_v28  ;;  %1094 = vmatpush.msra.mxu1 %v1824_v60  ;;  %v1029_v28 = vadd.f32 %v1027_v7, %v1931_v40 }
 0x15c   : > { %1065 = vmatpush.msra.mxu3 %v1707_v30  ;;  %1300 = vmatmul.msk.f32.vlgmr.msra.gmra.mxu1 %vm759_vm8, %v1030_v3  ;;  %v1104_v6 = vadd.f32 %v1102_v45, %v731_v4 }
 0x15d   : > { %1139 = vmatpush.msra.mxu2 %v1707_v30  ;;  %1167 = vmatpush.msra.mxu0 %v1808_v55  ;;  %v1101_v30 = vmul.f32 0.2, %v1029_v28 }
 0x15e   : > { %1066 = vmatpush.msra.mxu3 %v1724_v32 }
 0x15f   : > { %1140 = vmatpush.msra.mxu2 %v1724_v32  ;;  %1168 = vmatpush.msra.mxu0 %v1824_v60  ;;  %v1103_v32 = vadd.f32 %v1101_v30, %v1931_v40 }
 0x160   : > { %1067 = vmatpush.msra.mxu3 %v1745_v42  ;;  %1301 = vmatmul.msk.f32.vlgmr.msra.gmra.mxu0 %vm759_vm8, %v1104_v6 }
 0x161   : > { %1141 = vmatpush.msra.mxu2 %v1745_v42  ;;  %v758_v42 = vld [vmem:[%s2060_s4] sm:$0x1] }
 0x162   : > { %1068 = vmatpush.msra.mxu3 %v1757_v44 }
 0x163   : > { %1142 = vmatpush.msra.mxu2 %v1757_v44 }
 0x164   : > { %1069 = vmatpush.msra.mxu3 %v1771_v46 }
 0x165   : > { %1143 = vmatpush.msra.mxu2 %v1771_v46 }
 0x166   : > { %1070 = vmatpush.msra.mxu3 %v1789_v51 }
 0x167   : > { %1144 = vmatpush.msra.mxu2 %v1789_v51 }
 0x168   : > { %1071 = vmatpush.msra.mxu3 %v1803_v54 }
 0x169   : > { %1145 = vmatpush.msra.mxu2 %v1803_v54 }
 0x16a   : > { %1072 = vmatpush.msra.mxu3 %v1819_v59 }
 0x16b   : > { %1146 = vmatpush.msra.mxu2 %v1819_v59 }
 0x16c   : > { %1073 = vmatpush.msra.mxu3 %v1842_v9 }
 0x16d   : > { %1147 = vmatpush.msra.mxu2 %v1842_v9  ;;  %v907_v9 = vld [vmem:[%s2060_s4] sm:$0x1] }
 0x16e   : > { %1074 = vmatpush.msra.mxu3 %v1850_v10 }
 0x16f   : > { %1148 = vmatpush.msra.mxu2 %v1850_v10  ;;  %1075 = vmatmul.f32.vlgmr.msra.gmra.mxu3 %v1029_v28 }
 0x170   : > { %1149 = vmatmul.f32.vlgmr.msra.gmra.mxu2 %v1103_v32 }
 0x1c7   : > { %v780_v44 = vpop.f32.mrf.mxu0  ;;  %v800_v47 = vpop.f32.mrf.mxu1 }
 0x1c8   : > { %v781_v46 = vadd.f32 %v780_v44, %v758_v42 }
 0x1ca   : > { %v801_v51 = vadd.f32 %v800_v47, %v781_v46 }
 0x1cc   : > { %803 = vst [vmem:[%s2001_s28] sm:$0x1] %v801_v51 }
 0x1d0   : > { %v928_v10 = vpop.f32.mrf.mxu1 }
 0x1d1   : > { %v854_v54 = vpop.f32.mrf.mxu2  ;;  %v874_v55 = vpop.f32.mrf.mxu3  ;;  %v929_v61 = vadd.f32 %v928_v10, %v907_v9 }
 0x1d2   : > { %v855_v59 = vadd.f32 %v854_v54, %v833_v52 }
 0x1d4   : > { %v875_v60 = vadd.f32 %v874_v55, %v855_v59  ;;  %v1002_v11 = vpop.f32.mrf.mxu0 }
 0x1d5   : > { %v1003_v62 = vadd.f32 %v1002_v11, %v981_v8 }
 0x1d6   : > { %877 = vst [vmem:[%s2001_s28 + $0x1] sm:$0x1] %v875_v60  ;;  %v878_v20 = vadd.f32 %v875_v60, %v801_v51 }
 0x1d9   : > { %v1096_v24 = vpop.f32.mrf.mxu1 }
 0x1da   : > { %v948_v21 = vpop.f32.mrf.mxu3 }
 0x1db   : > { %v949_v12 = vadd.f32 %v948_v21, %v929_v61  ;;  %v1022_v13 = vpop.f32.mrf.mxu2 }
 0x1dc   : > { %v1023_v19 = vadd.f32 %v1022_v13, %v1003_v62 }
 0x1dd   : > { %951 = vst [vmem:[%s2001_s28 + $0x2] sm:$0x1] %v949_v12  ;;  %v952_v23 = vadd.f32 %v949_v12, %v878_v20  ;;  %v1170_v35 = vpop.f32.mrf.mxu0 }
 0x1de   : > { %1025 = vst [vmem:[%s2001_s28 + $0x3] sm:$0x1] %v1023_v19 }
 0x1df   : > { %v1026_v33 = vadd.f32 %v1023_v19, %v952_v23 }
 0x1f2   : > { %v1076_v27 = vpop.f32.mrf.mxu3 }
 0x1f3   : > { %v1077_v48 = vadd.f32 %v1076_v27, %v1055_v22  ;;  %v1150_v49 = vpop.f32.mrf.mxu2 }
 0x1f4   : > { %v1151_v53 = vadd.f32 %v1150_v49, %v1129_v26 }
 0x1f5   : > { %v1097_v14 = vadd.f32 %v1096_v24, %v1077_v48 }
 0x1f6   : > { %v1171_v25 = vadd.f32 %v1170_v35, %v1151_v53 }
 0x1f7   : > { %1099 = vst [vmem:[%s2001_s28 + $0x4] sm:$0x1] %v1097_v14  ;;  %v1100_v36 = vadd.f32 %v1097_v14, %v1026_v33 }
 0x1f8   : > { %1173 = vst [vmem:[%s2001_s28 + $0x5] sm:$0x1] %v1171_v25  ;;  %s1409_s28 = scalar_lea.hbm %s2062_s6, 2 }
 0x1f9   : > { %v1174_v39 = vadd.f32 %v1171_v25, %v1100_v36  ;;  %p1411_p4 = scmp.lt.s32.totalorder %s1409_s28, %s1405_s12 }
 0x1fb   : > { %v1175_v63 = vmul.f32 0.16666667, %v1174_v39  ;;  %p1412_p7 = por %p1411_p4, %p1410_p3 }
 0x1fd   : > { %1176 = vst [vmem:[%s267_s29] sm:$0x1] %v1175_v63  ;;  %p1413_p8 = pnand %p1412_p7, %p1408_p2 }
 0x1ff   : > { %1416 = shalt.err (!%p1413_p8)
}
 0x200   : > { %1309 = dma.vmem_to_hbm [thread:$0]  (%p1535_p5), %s1196_s9, 16, %s1198_s16, %s1182_s10  }
 0x201 PF: > { %p1321_p9 = scmp.ge.s32.totalorder %s1455_s24, 2  ;;  %s1216_s17 = sand.u32 1, %s1443_s21  }
 0x202   : > { %s1217_s18 = scalar_lea.sflag [#allocation4], %s1216_s17 }
 0x203   : > { %p1316_p10 = pnand %p1321_p9, %p1539_p6 }
 0x205   : > { %p1317_p11 = pneg %p1316_p10 }
 0x207   : > { %1438 = dma.done.wait (%p1317_p11), %s1217_s18, 16  }
 0x208   : > { %1440 = vsyncadd (%p1317_p11), %s1217_s18, 4294967280  ;;  %p18_p12 = scmp.ge.s32.totalorder %s1522_s27, 4   ;;  %s2065_s21 = smov %s1447_s22 }
 0x209   : > { %s2066_s22 = smov %s1451_s23  ;;  %s2067_s23 = smov %s1533_s30 }
 0x20a   : > { %s2068_s24 = smov %s1522_s27  ;;  %20 = sbr.rel (!%p18_p12) target bundleno = 4 (0x4), region = 100 }
 0x20f   :  { %1222 = vsyncpa [#allocation3], 1 }
 0x210   :  { %1224 = vsyncpa [#allocation3 + $0x1], 1 }
 0x211   :  { %1225 = vsyncpa [#allocation4], 1 }
 0x212   :  { %1227 = vsyncpa [#allocation4 + $0x1], 1 }

</bundles_post_ra>
